<compile_context>
chip_gen: v7x
topology: tpu7x:2x2x1
jax: 0.10.0
libtpu: 0.0.40
codegen_flags: <defaults>
</compile_context>

<pallas_src>
import functools

import jax
import jax.numpy as jnp
from jax.experimental import pallas as pl
from jax.experimental.pallas import tpu as pltpu

PAD = 5                  # max padding over the three branches (pad == dilation)
DILATIONS = (1, 3, 5)


def _empty_block_kernel(s1_ref, s2_ref, s3_ref, wt_ref, b_ref, out_ref, *,
                        tile_h, W, cout):
    """One (batch, H-row-block) tile per grid step.

    s{1,2,3}_ref : (tile_h + 2*PAD, W, 192) bf16
        dx-concatenated, halo-windowed input slab for dilation 1 / 3 / 5.
    wt_ref : (9, 192, cout) bf16   fused (conv_i @ w4_i) weights, one per (dil, dy)
    b_ref  : (1, 1, cout) f32      fused bias (sum_i b_i @ w4_i + b4)
    out_ref: (tile_h, W, cout) f32
    """
    slabs = (s1_ref, s2_ref, s3_ref)
    # Single f32 accumulator seeded with the fused bias; one store at the end.
    acc = jnp.broadcast_to(b_ref[...], (tile_h, W, cout))
    t = 0
    for di, d in enumerate(DILATIONS):
        for dy in (-1, 0, 1):
            h0 = PAD + dy * d                       # static leading-dim offset
            patch = slabs[di][h0:h0 + tile_h, :, :]  # (tile_h, W, 192) bf16
            acc = acc + jnp.einsum('hwc,co->hwo', patch, wt_ref[t],
                                   preferred_element_type=jnp.float32)
            t += 1
    out_ref[...] = acc


def _pick_tile_h(H, W, N, K, cout):
    """Largest multiple-of-8 row tile dividing H that fits a conservative VMEM
    budget, keeping >= 2 total grid steps so both v7x TensorCores get work."""
    cands = [t for t in range(8, H + 1, 8) if H % t == 0] or [H]

    def vmem_bytes(t):
        win = (t + 2 * PAD) * W * K * 2            # bf16 halo window, per slab
        out = t * W * cout * 4                     # f32 output block
        return 2 * (3 * win + out)                 # double-buffered

    fit = [t for t in cands if vmem_bytes(t) <= (12 << 20)] or [cands[0]]
    pick = max(fit)
    if N * (H // pick) < 2:                        # ensure >= 2 grid steps
        halved = [t for t in fit if H // t >= 2]
        if halved:
            pick = max(halved)
    return pick


def empty_block_forward(x_nchw, params):
    """x_nchw: (N, 64, H, W) float32  ->  (N, 64, H, W) float32."""
    w1, b1, w2, b2, w3, b3, w4, b4 = params
    N, cin, H, W = x_nchw.shape
    cout = w4.shape[-1]
    K = 3 * cin                                                  # 192

    # ---- fold the 1x1 conv + all biases into the branch weights (exact, f32) ----
    w4_split = w4.reshape(3, cin, cout)                          # (x1, x2, x3) order
    fused = [jnp.einsum('xyio,oq->xyiq', w, w4_split[i])
             for i, w in enumerate((w1, w2, w3))]                # 3 x (3,3,cin,cout)
    # dx-concatenated tap weights: one (K, cout) matrix per (dilation, dy).
    # fused[i].reshape(3, K, cout) merges (dx, cin) with dx-major ordering,
    # matching the channel order of the dx-concatenated slabs below.
    wt = jnp.concatenate([fw.reshape(3, K, cout) for fw in fused],
                         axis=0).astype(jnp.bfloat16)            # (9, K, cout)
    b_fused = (b1 @ w4_split[0] + b2 @ w4_split[1] + b3 @ w4_split[2] + b4)
    b_fused = b_fused.reshape(1, 1, cout).astype(jnp.float32)

    # ---- bf16 NHWC padded slab (cast first: pad/concat/gather move bf16) ----
    x = jnp.transpose(x_nchw.astype(jnp.bfloat16), (0, 2, 3, 1))         # NHWC
    xpad = jnp.pad(x, ((0, 0), (PAD, PAD), (PAD, PAD), (0, 0)))          # (N,Hp,Wp,cin)

    tile_h = _pick_tile_h(H, W, N, K, cout)
    n_hb = H // tile_h
    win_h = tile_h + 2 * PAD

    # ---- wrapper-side dx-concat (K=192) + halo-windowed H row blocks ----
    # slab_d[n, hb, r, w, :] = concat_dx xpad[n, hb*tile_h + r, w + PAD + dx*d, :]
    row_idx = (jnp.arange(n_hb)[:, None] * tile_h
               + jnp.arange(win_h)[None, :])                             # (n_hb, win_h)
    slabs = []
    for d in DILATIONS:
        s = jnp.concatenate([xpad[:, :, PAD - d:PAD - d + W, :],
                             xpad[:, :, PAD:PAD + W, :],
                             xpad[:, :, PAD + d:PAD + d + W, :]], axis=-1)
        slabs.append(s[:, row_idx])                         # (N, n_hb, win_h, W, K)

    kernel = functools.partial(_empty_block_kernel,
                               tile_h=tile_h, W=W, cout=cout)

    slab_spec = pl.BlockSpec((None, None, win_h, W, K),
                             lambda n, hb: (n, hb, 0, 0, 0))

    out_nhwc = pl.pallas_call(
        kernel,
        out_shape=jax.ShapeDtypeStruct((N, H, W, cout), jnp.float32),
        grid_spec=pltpu.PrefetchScalarGridSpec(
            num_scalar_prefetch=0,
            grid=(N, n_hb),
            in_specs=[
                slab_spec, slab_spec, slab_spec,
                pl.BlockSpec((9, K, cout), lambda n, hb: (0, 0, 0)),
                pl.BlockSpec((1, 1, cout), lambda n, hb: (0, 0, 0)),
            ],
            out_specs=pl.BlockSpec((None, tile_h, W, cout),
                                   lambda n, hb: (n, hb, 0, 0)),
        ),
        compiler_params=pltpu.CompilerParams(
            dimension_semantics=("parallel", "parallel")),
    )(*slabs, wt, b_fused)

    return jnp.transpose(out_nhwc, (0, 3, 1, 2)).astype(x_nchw.dtype)


def _reference_forward(x_nchw, params):
    """Pure-JAX f32 reference (lax conv) mirroring the PyTorch forward."""
    w1, b1, w2, b2, w3, b3, w4, b4 = params

    def conv3x3(x, w_hwio, b, d):
        y = jax.lax.conv_general_dilated(
            x, w_hwio, window_strides=(1, 1),
            padding=((d, d), (d, d)), rhs_dilation=(d, d),
            dimension_numbers=('NCHW', 'HWIO', 'NCHW'))
        return y + b[None, :, None, None]

    x1 = conv3x3(x_nchw, w1, b1, 1)
    x2 = conv3x3(x_nchw, w2, b2, 3)
    x3 = conv3x3(x_nchw, w3, b3, 5)
    xcat = jnp.concatenate([x1, x2, x3], axis=1)               # (N, 192, H, W)
    w4_hwio = w4.reshape(1, 1, 192, -1)
    out = jax.lax.conv_general_dilated(
        xcat, w4_hwio, window_strides=(1, 1), padding='VALID',
        dimension_numbers=('NCHW', 'HWIO', 'NCHW'))
    return out + b4[None, :, None, None]


def _init_params(key, cin=64, feature_dim=64):
    ks = jax.random.split(key, 8)
    s = 0.02
    w1 = jax.random.normal(ks[0], (3, 3, cin, feature_dim), jnp.float32) * s
    w2 = jax.random.normal(ks[1], (3, 3, cin, feature_dim), jnp.float32) * s
    w3 = jax.random.normal(ks[2], (3, 3, cin, feature_dim), jnp.float32) * s
    b1 = jax.random.normal(ks[3], (feature_dim,), jnp.float32) * s
    b2 = jax.random.normal(ks[4], (feature_dim,), jnp.float32) * s
    b3 = jax.random.normal(ks[5], (feature_dim,), jnp.float32) * s
    w4 = jax.random.normal(ks[6], (3 * feature_dim, feature_dim),
                           jnp.float32) * s
    b4 = jax.random.normal(ks[7], (feature_dim,), jnp.float32) * s
    return (w1, b1, w2, b2, w3, b3, w4, b4)


if __name__ == "__main__":
    key = jax.random.PRNGKey(0)
    kx, kp = jax.random.split(key)

    N, CIN, H, W = 2, 64, 16, 16          # conv1/2/3 require 64 input channels
    x = jax.random.normal(kx, (N, CIN, H, W), jnp.float32)
    params = _init_params(kp, cin=CIN, feature_dim=64)

    out = jax.jit(empty_block_forward)(x, params)
    out = jax.block_until_ready(out)

    ref = _reference_forward(x, params)
    assert out.shape == (N, 64, H, W), out.shape
    # bf16 matmuls (f32 accumulation) -> relaxed tolerance vs f32 reference.
    assert jnp.allclose(out, ref, atol=3e-2, rtol=3e-2), \
        float(jnp.max(jnp.abs(out - ref)))

    print("KERNEL_OK")
</pallas_src>

<mosaic_0001>
module attributes {stable_mosaic.version = 11 : i64} {
  func.func @_empty_block_kernel(%arg0: i32, %arg1: i32, %arg2: memref<1x1x26x16x192xbf16, #tpu.memory_space<vmem>>, %arg3: memref<1x1x26x16x192xbf16, #tpu.memory_space<vmem>>, %arg4: memref<1x1x26x16x192xbf16, #tpu.memory_space<vmem>>, %arg5: memref<9x192x64xbf16, #tpu.memory_space<vmem>>, %arg6: memref<1x1x64xf32, #tpu.memory_space<vmem>>, %arg7: memref<1x16x16x64xf32, #tpu.memory_space<vmem>>) attributes {dimension_semantics = [#tpu.dimension_semantics<parallel>, #tpu.dimension_semantics<parallel>], iteration_bounds = array<i64: 2, 1>, scalar_prefetch = 0 : i64, scratch_operands = 0 : i64, tpu.core_type = #tpu.core_type<tc>, window_params = [{transform_indices = @transform_0, window_bounds = array<i64: 1, 1, 26, 16, 192>}, {transform_indices = @transform_1, window_bounds = array<i64: 1, 1, 26, 16, 192>}, {transform_indices = @transform_2, window_bounds = array<i64: 1, 1, 26, 16, 192>}, {pipeline_mode = #tpu.pipeline_mode<synchronous>, transform_indices = @transform_3, window_bounds = array<i64: 9, 192, 64>}, {pipeline_mode = #tpu.pipeline_mode<synchronous>, transform_indices = @transform_4, window_bounds = array<i64: 1, 1, 64>}, {transform_indices = @transform_5, window_bounds = array<i64: 1, 16, 16, 64>}]} {
    %c0 = arith.constant 0 : index
    %c0_0 = arith.constant 0 : index
    %c0_1 = arith.constant 0 : index
    %0 = vector.load %arg6[%c0, %c0_0, %c0_1] : memref<1x1x64xf32, #tpu.memory_space<vmem>>, vector<1x1x64xf32>
    %1 = vector.shape_cast %0 : vector<1x1x64xf32> to vector<1x1x64xf32>
    %2 = vector.broadcast %1 : vector<1x1x64xf32> to vector<16x16x64xf32>
    %c0_2 = arith.constant 0 : index
    %c0_3 = arith.constant 0 : index
    %c4 = arith.constant 4 : index
    %c0_4 = arith.constant 0 : index
    %c0_5 = arith.constant 0 : index
    %3 = vector.load %arg2[%c0_2, %c0_3, %c4, %c0_4, %c0_5] : memref<1x1x26x16x192xbf16, #tpu.memory_space<vmem>>, vector<1x1x16x16x192xbf16>
    %4 = vector.shape_cast %3 : vector<1x1x16x16x192xbf16> to vector<16x16x192xbf16>
    %c0_6 = arith.constant 0 : index
    %c0_7 = arith.constant 0 : index
    %c0_8 = arith.constant 0 : index
    %5 = vector.load %arg5[%c0_6, %c0_7, %c0_8] : memref<9x192x64xbf16, #tpu.memory_space<vmem>>, vector<1x192x64xbf16>
    %6 = vector.shape_cast %5 : vector<1x192x64xbf16> to vector<192x64xbf16>
    "tpu.trace_start"() <{level = 10 : i32, message = "hwc,co->hwo"}> : () -> ()
    %cst = arith.constant dense<0.000000e+00> : vector<16x16x64xf32>
    %7 = tpu.matmul %4, %6, %cst {dimension_numbers = #tpu.dot_dimension_numbers<[2], [0], [0, 1], [1], [0, 0, 0, 1, 1, 1], [], []>} : vector<16x16x192xbf16>, vector<192x64xbf16>, vector<16x16x64xf32> -> vector<16x16x64xf32>
    "tpu.trace_stop"() : () -> ()
    %8 = arith.addf %2, %7 : vector<16x16x64xf32>
    %c0_9 = arith.constant 0 : index
    %c0_10 = arith.constant 0 : index
    %c5 = arith.constant 5 : index
    %c0_11 = arith.constant 0 : index
    %c0_12 = arith.constant 0 : index
    %9 = vector.load %arg2[%c0_9, %c0_10, %c5, %c0_11, %c0_12] : memref<1x1x26x16x192xbf16, #tpu.memory_space<vmem>>, vector<1x1x16x16x192xbf16>
    %10 = vector.shape_cast %9 : vector<1x1x16x16x192xbf16> to vector<16x16x192xbf16>
    %c1 = arith.constant 1 : index
    %c0_13 = arith.constant 0 : index
    %c0_14 = arith.constant 0 : index
    %11 = vector.load %arg5[%c1, %c0_13, %c0_14] : memref<9x192x64xbf16, #tpu.memory_space<vmem>>, vector<1x192x64xbf16>
    %12 = vector.shape_cast %11 : vector<1x192x64xbf16> to vector<192x64xbf16>
    "tpu.trace_start"() <{level = 10 : i32, message = "hwc,co->hwo"}> : () -> ()
    %cst_15 = arith.constant dense<0.000000e+00> : vector<16x16x64xf32>
    %13 = tpu.matmul %10, %12, %cst_15 {dimension_numbers = #tpu.dot_dimension_numbers<[2], [0], [0, 1], [1], [0, 0, 0, 1, 1, 1], [], []>} : vector<16x16x192xbf16>, vector<192x64xbf16>, vector<16x16x64xf32> -> vector<16x16x64xf32>
    "tpu.trace_stop"() : () -> ()
    %14 = arith.addf %8, %13 : vector<16x16x64xf32>
    %c0_16 = arith.constant 0 : index
    %c0_17 = arith.constant 0 : index
    %c6 = arith.constant 6 : index
    %c0_18 = arith.constant 0 : index
    %c0_19 = arith.constant 0 : index
    %15 = vector.load %arg2[%c0_16, %c0_17, %c6, %c0_18, %c0_19] : memref<1x1x26x16x192xbf16, #tpu.memory_space<vmem>>, vector<1x1x16x16x192xbf16>
    %16 = vector.shape_cast %15 : vector<1x1x16x16x192xbf16> to vector<16x16x192xbf16>
    %c2 = arith.constant 2 : index
    %c0_20 = arith.constant 0 : index
    %c0_21 = arith.constant 0 : index
    %17 = vector.load %arg5[%c2, %c0_20, %c0_21] : memref<9x192x64xbf16, #tpu.memory_space<vmem>>, vector<1x192x64xbf16>
    %18 = vector.shape_cast %17 : vector<1x192x64xbf16> to vector<192x64xbf16>
    "tpu.trace_start"() <{level = 10 : i32, message = "hwc,co->hwo"}> : () -> ()
    %cst_22 = arith.constant dense<0.000000e+00> : vector<16x16x64xf32>
    %19 = tpu.matmul %16, %18, %cst_22 {dimension_numbers = #tpu.dot_dimension_numbers<[2], [0], [0, 1], [1], [0, 0, 0, 1, 1, 1], [], []>} : vector<16x16x192xbf16>, vector<192x64xbf16>, vector<16x16x64xf32> -> vector<16x16x64xf32>
    "tpu.trace_stop"() : () -> ()
    %20 = arith.addf %14, %19 : vector<16x16x64xf32>
    %c0_23 = arith.constant 0 : index
    %c0_24 = arith.constant 0 : index
    %c2_25 = arith.constant 2 : index
    %c0_26 = arith.constant 0 : index
    %c0_27 = arith.constant 0 : index
    %21 = vector.load %arg3[%c0_23, %c0_24, %c2_25, %c0_26, %c0_27] : memref<1x1x26x16x192xbf16, #tpu.memory_space<vmem>>, vector<1x1x16x16x192xbf16>
    %22 = vector.shape_cast %21 : vector<1x1x16x16x192xbf16> to vector<16x16x192xbf16>
    %c3 = arith.constant 3 : index
    %c0_28 = arith.constant 0 : index
    %c0_29 = arith.constant 0 : index
    %23 = vector.load %arg5[%c3, %c0_28, %c0_29] : memref<9x192x64xbf16, #tpu.memory_space<vmem>>, vector<1x192x64xbf16>
    %24 = vector.shape_cast %23 : vector<1x192x64xbf16> to vector<192x64xbf16>
    "tpu.trace_start"() <{level = 10 : i32, message = "hwc,co->hwo"}> : () -> ()
    %cst_30 = arith.constant dense<0.000000e+00> : vector<16x16x64xf32>
    %25 = tpu.matmul %22, %24, %cst_30 {dimension_numbers = #tpu.dot_dimension_numbers<[2], [0], [0, 1], [1], [0, 0, 0, 1, 1, 1], [], []>} : vector<16x16x192xbf16>, vector<192x64xbf16>, vector<16x16x64xf32> -> vector<16x16x64xf32>
    "tpu.trace_stop"() : () -> ()
    %26 = arith.addf %20, %25 : vector<16x16x64xf32>
    %c0_31 = arith.constant 0 : index
    %c0_32 = arith.constant 0 : index
    %c5_33 = arith.constant 5 : index
    %c0_34 = arith.constant 0 : index
    %c0_35 = arith.constant 0 : index
    %27 = vector.load %arg3[%c0_31, %c0_32, %c5_33, %c0_34, %c0_35] : memref<1x1x26x16x192xbf16, #tpu.memory_space<vmem>>, vector<1x1x16x16x192xbf16>
    %28 = vector.shape_cast %27 : vector<1x1x16x16x192xbf16> to vector<16x16x192xbf16>
    %c4_36 = arith.constant 4 : index
    %c0_37 = arith.constant 0 : index
    %c0_38 = arith.constant 0 : index
    %29 = vector.load %arg5[%c4_36, %c0_37, %c0_38] : memref<9x192x64xbf16, #tpu.memory_space<vmem>>, vector<1x192x64xbf16>
    %30 = vector.shape_cast %29 : vector<1x192x64xbf16> to vector<192x64xbf16>
    "tpu.trace_start"() <{level = 10 : i32, message = "hwc,co->hwo"}> : () -> ()
    %cst_39 = arith.constant dense<0.000000e+00> : vector<16x16x64xf32>
    %31 = tpu.matmul %28, %30, %cst_39 {dimension_numbers = #tpu.dot_dimension_numbers<[2], [0], [0, 1], [1], [0, 0, 0, 1, 1, 1], [], []>} : vector<16x16x192xbf16>, vector<192x64xbf16>, vector<16x16x64xf32> -> vector<16x16x64xf32>
    "tpu.trace_stop"() : () -> ()
    %32 = arith.addf %26, %31 : vector<16x16x64xf32>
    %c0_40 = arith.constant 0 : index
    %c0_41 = arith.constant 0 : index
    %c8 = arith.constant 8 : index
    %c0_42 = arith.constant 0 : index
    %c0_43 = arith.constant 0 : index
    %33 = vector.load %arg3[%c0_40, %c0_41, %c8, %c0_42, %c0_43] : memref<1x1x26x16x192xbf16, #tpu.memory_space<vmem>>, vector<1x1x16x16x192xbf16>
    %34 = vector.shape_cast %33 : vector<1x1x16x16x192xbf16> to vector<16x16x192xbf16>
    %c5_44 = arith.constant 5 : index
    %c0_45 = arith.constant 0 : index
    %c0_46 = arith.constant 0 : index
    %35 = vector.load %arg5[%c5_44, %c0_45, %c0_46] : memref<9x192x64xbf16, #tpu.memory_space<vmem>>, vector<1x192x64xbf16>
    %36 = vector.shape_cast %35 : vector<1x192x64xbf16> to vector<192x64xbf16>
    "tpu.trace_start"() <{level = 10 : i32, message = "hwc,co->hwo"}> : () -> ()
    %cst_47 = arith.constant dense<0.000000e+00> : vector<16x16x64xf32>
    %37 = tpu.matmul %34, %36, %cst_47 {dimension_numbers = #tpu.dot_dimension_numbers<[2], [0], [0, 1], [1], [0, 0, 0, 1, 1, 1], [], []>} : vector<16x16x192xbf16>, vector<192x64xbf16>, vector<16x16x64xf32> -> vector<16x16x64xf32>
    "tpu.trace_stop"() : () -> ()
    %38 = arith.addf %32, %37 : vector<16x16x64xf32>
    %c0_48 = arith.constant 0 : index
    %c0_49 = arith.constant 0 : index
    %c0_50 = arith.constant 0 : index
    %c0_51 = arith.constant 0 : index
    %c0_52 = arith.constant 0 : index
    %39 = vector.load %arg4[%c0_48, %c0_49, %c0_50, %c0_51, %c0_52] : memref<1x1x26x16x192xbf16, #tpu.memory_space<vmem>>, vector<1x1x16x16x192xbf16>
    %40 = vector.shape_cast %39 : vector<1x1x16x16x192xbf16> to vector<16x16x192xbf16>
    %c6_53 = arith.constant 6 : index
    %c0_54 = arith.constant 0 : index
    %c0_55 = arith.constant 0 : index
    %41 = vector.load %arg5[%c6_53, %c0_54, %c0_55] : memref<9x192x64xbf16, #tpu.memory_space<vmem>>, vector<1x192x64xbf16>
    %42 = vector.shape_cast %41 : vector<1x192x64xbf16> to vector<192x64xbf16>
    "tpu.trace_start"() <{level = 10 : i32, message = "hwc,co->hwo"}> : () -> ()
    %cst_56 = arith.constant dense<0.000000e+00> : vector<16x16x64xf32>
    %43 = tpu.matmul %40, %42, %cst_56 {dimension_numbers = #tpu.dot_dimension_numbers<[2], [0], [0, 1], [1], [0, 0, 0, 1, 1, 1], [], []>} : vector<16x16x192xbf16>, vector<192x64xbf16>, vector<16x16x64xf32> -> vector<16x16x64xf32>
    "tpu.trace_stop"() : () -> ()
    %44 = arith.addf %38, %43 : vector<16x16x64xf32>
    %c0_57 = arith.constant 0 : index
    %c0_58 = arith.constant 0 : index
    %c5_59 = arith.constant 5 : index
    %c0_60 = arith.constant 0 : index
    %c0_61 = arith.constant 0 : index
    %45 = vector.load %arg4[%c0_57, %c0_58, %c5_59, %c0_60, %c0_61] : memref<1x1x26x16x192xbf16, #tpu.memory_space<vmem>>, vector<1x1x16x16x192xbf16>
    %46 = vector.shape_cast %45 : vector<1x1x16x16x192xbf16> to vector<16x16x192xbf16>
    %c7 = arith.constant 7 : index
    %c0_62 = arith.constant 0 : index
    %c0_63 = arith.constant 0 : index
    %47 = vector.load %arg5[%c7, %c0_62, %c0_63] : memref<9x192x64xbf16, #tpu.memory_space<vmem>>, vector<1x192x64xbf16>
    %48 = vector.shape_cast %47 : vector<1x192x64xbf16> to vector<192x64xbf16>
    "tpu.trace_start"() <{level = 10 : i32, message = "hwc,co->hwo"}> : () -> ()
    %cst_64 = arith.constant dense<0.000000e+00> : vector<16x16x64xf32>
    %49 = tpu.matmul %46, %48, %cst_64 {dimension_numbers = #tpu.dot_dimension_numbers<[2], [0], [0, 1], [1], [0, 0, 0, 1, 1, 1], [], []>} : vector<16x16x192xbf16>, vector<192x64xbf16>, vector<16x16x64xf32> -> vector<16x16x64xf32>
    "tpu.trace_stop"() : () -> ()
    %50 = arith.addf %44, %49 : vector<16x16x64xf32>
    %c0_65 = arith.constant 0 : index
    %c0_66 = arith.constant 0 : index
    %c10 = arith.constant 10 : index
    %c0_67 = arith.constant 0 : index
    %c0_68 = arith.constant 0 : index
    %51 = vector.load %arg4[%c0_65, %c0_66, %c10, %c0_67, %c0_68] : memref<1x1x26x16x192xbf16, #tpu.memory_space<vmem>>, vector<1x1x16x16x192xbf16>
    %52 = vector.shape_cast %51 : vector<1x1x16x16x192xbf16> to vector<16x16x192xbf16>
    %c8_69 = arith.constant 8 : index
    %c0_70 = arith.constant 0 : index
    %c0_71 = arith.constant 0 : index
    %53 = vector.load %arg5[%c8_69, %c0_70, %c0_71] : memref<9x192x64xbf16, #tpu.memory_space<vmem>>, vector<1x192x64xbf16>
    %54 = vector.shape_cast %53 : vector<1x192x64xbf16> to vector<192x64xbf16>
    "tpu.trace_start"() <{level = 10 : i32, message = "hwc,co->hwo"}> : () -> ()
    %cst_72 = arith.constant dense<0.000000e+00> : vector<16x16x64xf32>
    %55 = tpu.matmul %52, %54, %cst_72 {dimension_numbers = #tpu.dot_dimension_numbers<[2], [0], [0, 1], [1], [0, 0, 0, 1, 1, 1], [], []>} : vector<16x16x192xbf16>, vector<192x64xbf16>, vector<16x16x64xf32> -> vector<16x16x64xf32>
    "tpu.trace_stop"() : () -> ()
    %56 = arith.addf %50, %55 : vector<16x16x64xf32>
    %c0_73 = arith.constant 0 : index
    %c0_74 = arith.constant 0 : index
    %c0_75 = arith.constant 0 : index
    %c0_76 = arith.constant 0 : index
    %57 = vector.load %arg7[%c0_73, %c0_74, %c0_75, %c0_76] : memref<1x16x16x64xf32, #tpu.memory_space<vmem>>, vector<1x16x16x64xf32>
    %58 = vector.shape_cast %57 : vector<1x16x16x64xf32> to vector<16x16x64xf32>
    %59 = vector.shape_cast %56 : vector<16x16x64xf32> to vector<1x16x16x64xf32>
    tpu.vector_store %arg7[%c0_73, %c0_74, %c0_75, %c0_76], %59 {strides = array<i32>} : memref<1x16x16x64xf32, #tpu.memory_space<vmem>>, vector<1x16x16x64xf32>,
    return
  }
  func.func @transform_0(%arg0: i32, %arg1: i32) -> (i32, i32, i32, i32, i32) {
    %c0_i32 = arith.constant 0 : i32
    %c0_i32_0 = arith.constant 0 : i32
    %c0_i32_1 = arith.constant 0 : i32
    %c0_i32_2 = arith.constant 0 : i32
    return %arg0, %arg1, %c0_i32, %c0_i32_0, %c0_i32_1 : i32, i32, i32, i32, i32
  }
  func.func @transform_1(%arg0: i32, %arg1: i32) -> (i32, i32, i32, i32, i32) {
    %c0_i32 = arith.constant 0 : i32
    %c0_i32_0 = arith.constant 0 : i32
    %c0_i32_1 = arith.constant 0 : i32
    %c0_i32_2 = arith.constant 0 : i32
    return %arg0, %arg1, %c0_i32, %c0_i32_0, %c0_i32_1 : i32, i32, i32, i32, i32
  }
  func.func @transform_2(%arg0: i32, %arg1: i32) -> (i32, i32, i32, i32, i32) {
    %c0_i32 = arith.constant 0 : i32
    %c0_i32_0 = arith.constant 0 : i32
    %c0_i32_1 = arith.constant 0 : i32
    %c0_i32_2 = arith.constant 0 : i32
    return %arg0, %arg1, %c0_i32, %c0_i32_0, %c0_i32_1 : i32, i32, i32, i32, i32
  }
  func.func @transform_3(%arg0: i32, %arg1: i32) -> (i32, i32, i32) {
    %c0_i32 = arith.constant 0 : i32
    %c0_i32_0 = arith.constant 0 : i32
    %c0_i32_1 = arith.constant 0 : i32
    %c0_i32_2 = arith.constant 0 : i32
    return %c0_i32, %c0_i32_0, %c0_i32_1 : i32, i32, i32
  }
  func.func @transform_4(%arg0: i32, %arg1: i32) -> (i32, i32, i32) {
    %c0_i32 = arith.constant 0 : i32
    %c0_i32_0 = arith.constant 0 : i32
    %c0_i32_1 = arith.constant 0 : i32
    %c0_i32_2 = arith.constant 0 : i32
    return %c0_i32, %c0_i32_0, %c0_i32_1 : i32, i32, i32
  }
  func.func @transform_5(%arg0: i32, %arg1: i32) -> (i32, i32, i32, i32) {
    %c0_i32 = arith.constant 0 : i32
    %c0_i32_0 = arith.constant 0 : i32
    %c0_i32_1 = arith.constant 0 : i32
    return %arg0, %arg1, %c0_i32, %c0_i32_0 : i32, i32, i32, i32
  }
}

</mosaic_0001>

<bundles_post_ra>
// kernel: empty_block_forward.1
= control target key start
LH: loop header
LB: loop body
LE: loop exit
PB: predicated region body
PF: predicated region fallthrough
CT: control target
= control target key end

     0   :  { %10 = vsyncpa [#allocation3], 0  ;;  %s8622_s0 = inlined_call_operand.vmem [shape: bf16[2,1,26,16,192], index: 0, kind: input, shape index: {}]   ;;  %s8623_s1 = inlined_call_operand.vmem [shape: bf16[2,1,26,16,192], index: 1, kind: input, shape index: {}]   ;;  %s8624_s2 = inlined_call_operand.vmem [shape: bf16[2,1,26,16,192], index: 2, kind: input, shape index: {}]   ;;  %s8625_s3 = inlined_call_operand.vmem [shape: bf16[9,192,64], index: 3, kind: input, shape index: {}]   ;;  %s8626_s4 = inlined_call_operand.vmem [shape: f32[1,1,64], index: 4, kind: input, shape index: {}]   ;;  %s8627_s5 = inlined_call_operand.hbm [shape: f32[2,16,16,64], index: 5, kind: output, shape index: {}]  }
   0x1   :  { %12 = vsyncpa [#allocation3 + $0x1], 0  ;;  %s7256_s18 = smov 0   ;;  %s7258_s19 = smov 0  }
   0x2   :  { %s7260_s20 = smov 0   ;;  %s7262_s21 = smov 0  }
   0x3   :  { %s7264_s22 = smov 0   ;;  %s7266_s23 = smov 0  }
   0x4 LB: > { %s5135_s24 = sadd.s32 4294967295, %s7220_s23   ;;  %s5136_s25 = sadd.s32 4294967294, %s7220_s23   ;;  %s7220_s23 = sphi %s7266_s23, %s18_s23   ;;  %s7216_s22 = sphi %s7264_s22, %s8634_s22   ;;  %s7212_s21 = sphi %s7262_s21, %s8633_s21   ;;  %s7208_s20 = sphi %s7260_s20, %s8632_s20   ;;  %s7204_s19 = sphi %s7258_s19, %s8631_s19   ;;  %s7200_s18 = sphi %s7256_s18, %s8630_s18  }
   0x5   : > { %s30_s26 = sadd.s32 1, %s7216_s22  ;;  %s165_s27 = sadd.s32 1, %s7208_s20 }
   0x6   : > { %p32_p0 = scmp.ge.s32.totalorder %s30_s26, 2  ;;  %p175_p1 = scmp.ne.s32.totalorder %s7208_s20, %s7204_s19 }
   0x7   : > { %p176_p2 = scmp.eq.s32.totalorder %s5135_s24, 1  ;;  %p181_p3 = scmp.ne.s32.totalorder %s7204_s19, %s7200_s18 }
   0x8   : > { %s8636_s26 = smov (%p32_p0, %s30_s26), 0  ;;  %p182_p5 = scmp.eq.s32.totalorder %s5136_s25, 1 }
   0x9   : > { %p7296_p4 = por %p176_p2, %p175_p1  ;;  %s160_s29 = ssub.s32 %s7216_s22, %s8636_s26 }
   0xa   : > { %p5139_p6 = scmp.ge.s32.totalorder %s7220_s23, 1  ;;  %p163_p7 = scmp.eq.s32.totalorder %s160_s29, 0 }
   0xb   : > { %p7303_p8 = por %p182_p5, %p181_p3  ;;  %p242_p9 = scmp.lt.s32.totalorder %s7220_s23, 3 }
   0xc   : > { %s7309_s6 = scalar_select %p163_p7, %s7208_s20, %s165_s27  }
   0xd   : > { %p243_p10 = pnand %p5139_p6, %p242_p9 }
   0xe   : > { %v6734_v0 = vld [vmem:[%s8625_s3] sm:$0xff] (!%p243_p10)   ;;  %v7222_v1 = vmov (!%p243_p10), 0   ;;  %v6736_v3 = vld [vmem:[%s8625_s3 + $0x8] sm:$0xff] (!%p243_p10)   ;;  %v6738_v5 = vld [vmem:[%s8625_s3 + $0x10] sm:$0xff] (!%p243_p10)   ;;  %p292_p11 = scmp.lt.s32.totalorder (!%p243_p10), %s7212_s21, 1  ;;  %vm601_vm0 = vcmask (!%p243_p10), 523264  }
   0xf   : > { %246 = sbr.rel (%p243_p10) target bundleno = 864 (0x360), region = 40  ;;  %650 = vmatprep.subr.bf16.mxu1 (!%p243_p10), %v7222_v1  ;;  %2710 = vmatprep.subr.bf16.mxu0 (!%p243_p10), %v7222_v1  ;;  %v6735_v2 = vld [vmem:[%s8625_s3 + $0x180] sm:$0xff] (!%p243_p10)   ;;  %v6737_v4 = vld [vmem:[%s8625_s3 + $0x188] sm:$0xff] (!%p243_p10)   ;;  %v6739_v6 = vld [vmem:[%s8625_s3 + $0x190] sm:$0xff] (!%p243_p10)   ;;  %s6138_s11 = sshll.u32 (!%p243_p10), %s7212_s21, 12 }
  0x10   : > { %651 = vmatpush1.bf16.msra.mxu1 (!%p243_p10), %v6734_v0  ;;  %2711 = vmatpush1.bf16.msra.mxu0 (!%p243_p10), %v6735_v2  ;;  %v6740_v7 = vld [vmem:[%s8625_s3 + $0x18] sm:$0xff] (!%p243_p10)   ;;  %v6742_v9 = vld [vmem:[%s8625_s3 + $0x20] sm:$0xff] (!%p243_p10)   ;;  %v6744_v11 = vld [vmem:[%s8625_s3 + $0x28] sm:$0xff] (!%p243_p10)   ;;  %s7223_s24 = smov (!%p243_p10), [#allocation2]  }
  0x11   : > { %652 = vmatprep.subr.bf16.mxu1 (!%p243_p10), %v7222_v1  ;;  %2712 = vmatprep.subr.bf16.mxu0 (!%p243_p10), %v7222_v1  ;;  %v6741_v8 = vld [vmem:[%s8625_s3 + $0x198] sm:$0xff] (!%p243_p10)   ;;  %v6743_v10 = vld [vmem:[%s8625_s3 + $0x1a0] sm:$0xff] (!%p243_p10)   ;;  %v6745_v12 = vld [vmem:[%s8625_s3 + $0x1a8] sm:$0xff] (!%p243_p10)   ;;  %s7146_s25 = sshll.u32 (!%p243_p10), %s7223_s24, 4  ;;  %s7147_s25 = int_to_ptr.vmem [resolvable:$false] %s7146_s25 }
  0x12   : > { %v6746_v13 = vld [vmem:[%s8625_s3 + $0x30] sm:$0xff] (!%p243_p10)   ;;  %v6748_v16 = vld [vmem:[%s8625_s3 + $0x38] sm:$0xff] (!%p243_p10)   ;;  %v6750_v19 = vld [vmem:[%s8625_s3 + $0x40] sm:$0xff] (!%p243_p10)   ;;  %s7148_s27 = scalar_lea.vmem (!%p243_p10), %s7147_s25, 8192 }
  0x13   : > { %v6747_v14 = vld [vmem:[%s8625_s3 + $0x1b0] sm:$0xff] (!%p243_p10)   ;;  %v6749_v18 = vld [vmem:[%s8625_s3 + $0x1b8] sm:$0xff] (!%p243_p10)   ;;  %v6751_v20 = vld [vmem:[%s8625_s3 + $0x1c0] sm:$0xff] (!%p243_p10)  }
  0x14   : > { %653 = vmatpush1.bf16.msra.mxu1 (!%p243_p10), %v6736_v3  ;;  %2713 = vmatpush1.bf16.msra.mxu0 (!%p243_p10), %v6737_v4  ;;  %v6752_v21 = vld [vmem:[%s8625_s3 + $0x48] sm:$0xff] (!%p243_p10)   ;;  %v6754_v23 = vld [vmem:[%s8625_s3 + $0x50] sm:$0xff] (!%p243_p10)   ;;  %v6756_v25 = vld [vmem:[%s8625_s3 + $0x58] sm:$0xff] (!%p243_p10)  }
  0x15   : > { %654 = vmatprep.subr.bf16.mxu1 (!%p243_p10), %v7222_v1  ;;  %2714 = vmatprep.subr.bf16.mxu0 (!%p243_p10), %v7222_v1  ;;  %v6753_v22 = vld [vmem:[%s8625_s3 + $0x1c8] sm:$0xff] (!%p243_p10)   ;;  %v6755_v24 = vld [vmem:[%s8625_s3 + $0x1d0] sm:$0xff] (!%p243_p10)   ;;  %v6757_v26 = vld [vmem:[%s8625_s3 + $0x1d8] sm:$0xff] (!%p243_p10)  }
  0x16   : > { %s293_s10 = scalar_select %p292_p11, %s7212_s21, 1  ;;  %v6764_v29 = vld [vmem:[%s8625_s3 + $0x60] sm:$0xff]   ;;  %v6773_v33 = vld [vmem:[%s8625_s3 + $0x68] sm:$0xff]   ;;  %v6774_v37 = vld [vmem:[%s8625_s3 + $0x1f0] sm:$0xff]  }
  0x17   : > { %v6765_v30 = vld [vmem:[%s8625_s3 + $0x1e0] sm:$0xff]   ;;  %v6772_v35 = vld [vmem:[%s8625_s3 + $0x1e8] sm:$0xff]   ;;  %v6784_v40 = vld [vmem:[%s8625_s3 + $0x70] sm:$0xff]  }
  0x18   : > { %655 = vmatpush1.bf16.msra.mxu1 %v6738_v5  ;;  %2715 = vmatpush1.bf16.msra.mxu0 %v6739_v6  ;;  %s7356_s15 = smul.u32 416, %s293_s10  ;;  %v6781_v42 = vld [vmem:[%s8625_s3 + $0x1f8] sm:$0xff]   ;;  %v6789_v47 = vld [vmem:[%s8625_s3 + $0x200] sm:$0xff]   ;;  %v6790_v50 = vld [vmem:[%s8625_s3 + $0x208] sm:$0xff]  }
  0x19   : > { %656 = vmatprep.subr.bf16.mxu1 %v7222_v1  ;;  %2716 = vmatprep.subr.bf16.mxu0 %v7222_v1  ;;  %v6797_v44 = vld [vmem:[%s8625_s3 + $0x78] sm:$0xff]   ;;  %v6806_v48 = vld [vmem:[%s8625_s3 + $0x80] sm:$0xff]   ;;  %v6817_v52 = vld [vmem:[%s8625_s3 + $0x88] sm:$0xff]  }
  0x1a   : > { %s7370_s7 = scalar_lea.vmem %s8622_s0, %s7356_s15  ;;  %s7380_s12 = scalar_lea.vmem %s8623_s1, %s7356_s15  ;;  %v6798_v55 = vld [vmem:[%s8625_s3 + $0x210] sm:$0xff]   ;;  %v6805_v58 = vld [vmem:[%s8625_s3 + $0x218] sm:$0xff]   ;;  %v6807_v63 = vld [vmem:[%s8625_s3 + $0x220] sm:$0xff]  }
  0x1b   : > { %v6760_v15 = vld [vmem:[%s7370_s7 + $0x44] ss:$8 sps:$4 sm:$0xff]   ;;  %v6763_v17 = vld [vmem:[%s7380_s12 + $0x54] ss:$8 sps:$4 sm:$0xff]   ;;  %v6758_v27 = vld [vmem:[%s7370_s7 + $0x40] ss:$8 sps:$4 sm:$0xff]   ;;  %s7652_s13 = scalar_lea.vmem %s8624_s2, %s7356_s15  ;;  %s8566_s15 = scalar_lea.hbm %s8627_s5, %s6138_s11 }
  0x1c   : > { %657 = vmatpush1.bf16.msra.mxu1 %v6740_v7  ;;  %2717 = vmatpush1.bf16.msra.mxu0 %v6741_v8  ;;  %v6761_v28 = vld [vmem:[%s7380_s12 + $0x50] ss:$8 sps:$4 sm:$0xff]   ;;  %v7437_v31 = vld [vmem:[%s7370_s7 + $0x54] ss:$8 sps:$4 sm:$0xff]   ;;  %v6768_v32 = vld [vmem:[%s7380_s12 + $0x64] ss:$8 sps:$4 sm:$0xff]  }
  0x1d   : > { %658 = vmatprep.subr.bf16.mxu1 %v7222_v1  ;;  %2718 = vmatprep.subr.bf16.mxu0 %v7222_v1  ;;  %v7447_v34 = vld [vmem:[%s7370_s7 + $0x50] ss:$8 sps:$4 sm:$0xff]   ;;  %v6771_v36 = vld [vmem:[%s7380_s12 + $0x60] ss:$8 sps:$4 sm:$0xff]   ;;  %v7460_v38 = vld [vmem:[%s7370_s7 + $0x64] ss:$8 sps:$4 sm:$0xff]  }
  0x1e   : > { %5221 = vmatprep.mubr.msk.bf16.mxu1 %vm601_vm0, %v6760_v15  ;;  %5685 = vmatprep.mubr.msk.bf16.mxu0 %vm601_vm0, %v6763_v17  ;;  %v6777_v39 = vld [vmem:[%s7380_s12 + $0x74] ss:$8 sps:$4 sm:$0xff]   ;;  %v7473_v41 = vld [vmem:[%s7370_s7 + $0x60] ss:$8 sps:$4 sm:$0xff]   ;;  %v6780_v43 = vld [vmem:[%s7380_s12 + $0x70] ss:$8 sps:$4 sm:$0xff]  }
  0x1f   : > { %v7484_v45 = vld [vmem:[%s7370_s7 + $0x74] ss:$8 sps:$4 sm:$0xff]   ;;  %v7488_v46 = vld [vmem:[%s7380_s12 + $0x84] ss:$8 sps:$4 sm:$0xff]   ;;  %v7504_v49 = vld [vmem:[%s7370_s7 + $0x70] ss:$8 sps:$4 sm:$0xff]  }
  0x20   : > { %659 = vmatpush1.bf16.msra.mxu1 %v6742_v9  ;;  %2719 = vmatpush1.bf16.msra.mxu0 %v6743_v10  ;;  %v7510_v51 = vld [vmem:[%s7380_s12 + $0x80] ss:$8 sps:$4 sm:$0xff]   ;;  %v7517_v53 = vld [vmem:[%s7370_s7 + $0x84] ss:$8 sps:$4 sm:$0xff]   ;;  %v7521_v54 = vld [vmem:[%s7380_s12 + $0x94] ss:$8 sps:$4 sm:$0xff]  }
  0x21   : > { %660 = vmatprep.subr.bf16.mxu1 %v7222_v1  ;;  %2720 = vmatprep.subr.bf16.mxu0 %v7222_v1  ;;  %v6827_v56 = vld [vmem:[%s8625_s3 + $0x90] sm:$0xff]   ;;  %v7538_v57 = vld [vmem:[%s7370_s7 + $0x80] ss:$8 sps:$4 sm:$0xff]   ;;  %v6832_v60 = vld [vmem:[%s8625_s3 + $0x98] sm:$0xff]  }
  0x22   : > { %v7544_v59 = vld [vmem:[%s7380_s12 + $0x90] ss:$8 sps:$4 sm:$0xff]   ;;  %v7551_v61 = vld [vmem:[%s7370_s7 + $0x94] ss:$8 sps:$4 sm:$0xff]   ;;  %v7555_v62 = vld [vmem:[%s7380_s12 + $0xa4] ss:$8 sps:$4 sm:$0xff]  }
  0x23   : > { %v6839_v0 = vld [vmem:[%s8625_s3 + $0xa0] sm:$0xff]   ;;  %v7572_v2 = vld [vmem:[%s7370_s7 + $0x90] ss:$8 sps:$4 sm:$0xff]   ;;  %v6814_v3 = vld [vmem:[%s8625_s3 + $0x228] sm:$0xff]  }
  0x24   : > { %661 = vmatpush1.bf16.msra.mxu1 %v6744_v11  ;;  %2721 = vmatpush1.bf16.msra.mxu0 %v6745_v12  ;;  %v7578_v4 = vld [vmem:[%s7380_s12 + $0xa0] ss:$8 sps:$4 sm:$0xff]   ;;  %v7585_v6 = vld [vmem:[%s7370_s7 + $0xa4] ss:$8 sps:$4 sm:$0xff]   ;;  %v7589_v7 = vld [vmem:[%s7380_s12 + $0xb4] ss:$8 sps:$4 sm:$0xff]  }
  0x25   : > { %662 = vmatprep.subr.bf16.mxu1 %v7222_v1  ;;  %2722 = vmatprep.subr.bf16.mxu0 %v7222_v1  ;;  %v6845_v5 = vld [vmem:[%s8625_s3 + $0xa8] sm:$0xff]   ;;  %v6822_v8 = vld [vmem:[%s8625_s3 + $0x230] sm:$0xff]   ;;  %v6823_v10 = vld [vmem:[%s8625_s3 + $0x238] sm:$0xff]  }
  0x26   : > { %v6853_v9 = vld [vmem:[%s8625_s3 + $0xb0] sm:$0xff]   ;;  %v6863_v11 = vld [vmem:[%s8625_s3 + $0xb8] sm:$0xff]   ;;  %v7613_v12 = vld [vmem:[%s7370_s7 + $0xa0] ss:$8 sps:$4 sm:$0xff]  }
  0x27   : > { %v6818_v15 = vld [vmem:[%s7380_s12 + $0xc4] ss:$8 sps:$4 sm:$0xff]   ;;  %v6821_v17 = vld [vmem:[%s7380_s12 + $0xc0] ss:$8 sps:$4 sm:$0xff]  }
  0x28   : > { %663 = vmatpush1.bf16.msra.mxu1 %v6746_v13  ;;  %2723 = vmatpush1.bf16.msra.mxu0 %v6747_v14  ;;  %v6813_v13 = vld [vmem:[%s7380_s12 + $0xb0] ss:$8 sps:$4 sm:$0xff]   ;;  %v7618_v14 = vld [vmem:[%s7370_s7 + $0xb4] ss:$8 sps:$4 sm:$0xff]  }
  0x29   : > { %664 = vmatprep.subr.bf16.mxu1 %v7222_v1  ;;  %2724 = vmatprep.subr.bf16.mxu0 %v7222_v1 }
  0x2c   : > { %665 = vmatpush1.bf16.msra.mxu1 %v6748_v16  ;;  %2725 = vmatpush1.bf16.msra.mxu0 %v6749_v18  ;;  %v7628_v16 = vld [vmem:[%s7370_s7 + $0xb0] ss:$8 sps:$4 sm:$0xff]   ;;  %v7632_v18 = vld [vmem:[%s7370_s7 + $0xc4] ss:$8 sps:$4 sm:$0xff]  }
  0x2d   : > { %666 = vmatprep.subr.bf16.mxu1 %v7222_v1  ;;  %2726 = vmatprep.subr.bf16.mxu0 %v7222_v1 }
  0x30   : > { %667 = vmatpush1.bf16.msra.mxu1 %v6750_v19  ;;  %2727 = vmatpush1.bf16.msra.mxu0 %v6751_v20  ;;  %v7640_v19 = vld [vmem:[%s7370_s7 + $0xc0] ss:$8 sps:$4 sm:$0xff]   ;;  %v7643_v20 = vld [vmem:[%s7370_s7 + $0xd4] ss:$8 sps:$4 sm:$0xff]  }
  0x31   : > { %668 = vmatprep.subr.bf16.mxu1 %v7222_v1  ;;  %2728 = vmatprep.subr.bf16.mxu0 %v7222_v1 }
  0x34   : > { %669 = vmatpush1.bf16.msra.mxu1 %v6752_v21  ;;  %2729 = vmatpush1.bf16.msra.mxu0 %v6753_v22  ;;  %v6828_v21 = vld [vmem:[%s8625_s3 + $0x240] sm:$0xff]   ;;  %v7661_v22 = vld [vmem:[%s7370_s7 + $0xd0] ss:$8 sps:$4 sm:$0xff]  }
  0x35   : > { %670 = vmatprep.subr.bf16.mxu1 %v7222_v1  ;;  %2730 = vmatprep.subr.bf16.mxu0 %v7222_v1 }
  0x38   : > { %671 = vmatpush1.bf16.msra.mxu1 %v6754_v23  ;;  %2731 = vmatpush1.bf16.msra.mxu0 %v6755_v24  ;;  %v6833_v23 = vld [vmem:[%s8625_s3 + $0x248] sm:$0xff]  }
  0x39   : > { %672 = vmatprep.subr.bf16.mxu1 %v7222_v1  ;;  %2732 = vmatprep.subr.bf16.mxu0 %v7222_v1  ;;  %v7668_v24 = vld [vmem:[%s7370_s7 + $0xe4] ss:$8 sps:$4 sm:$0xff]  }
  0x3c   : > { %673 = vmatpush1.bf16.msra.mxu1 %v6756_v25  ;;  %2733 = vmatpush1.bf16.msra.mxu0 %v6757_v26  ;;  %v6841_v25 = vld [vmem:[%s8625_s3 + $0x250] sm:$0xff]   ;;  %v6846_v26 = vld [vmem:[%s8625_s3 + $0x258] sm:$0xff]  }
  0x3d   : > { %1165 = vmatprep.subr.bf16.mxu1 %v7222_v1  ;;  %3225 = vmatprep.subr.bf16.mxu0 %v7222_v1 }
  0x3f   : > { %683 = vmatmul.mubr.bf16.vlgmr.msra.gmra.mrb[0].mxu1 %v6758_v27  ;;  %2743 = vmatmul.mubr.bf16.vlgmr.msra.gmra.mrb[0].mxu0 %v6761_v28  ;;  %v7684_v27 = vld [vmem:[%s7370_s7 + $0xe0] ss:$8 sps:$4 sm:$0xff]   ;;  %v7687_v28 = vld [vmem:[%s7370_s7 + $0xf4] ss:$8 sps:$4 sm:$0xff]  }
  0x40   : > { %1166 = vmatpush1.bf16.msra.mxu1 %v6764_v29  ;;  %3226 = vmatpush1.bf16.msra.mxu0 %v6765_v30  ;;  %v6854_v29 = vld [vmem:[%s8625_s3 + $0x260] sm:$0xff]   ;;  %v6868_v30 = vld [vmem:[%s8625_s3 + $0x268] sm:$0xff]  }
  0x41   : > { %5222 = vmatprep.mubr.msk.bf16.mxu1 %vm601_vm0, %v7437_v31  ;;  %5686 = vmatprep.mubr.msk.bf16.mxu0 %vm601_vm0, %v6768_v32  ;;  %v7704_v32 = vld [vmem:[%s7370_s7 + $0xf0] ss:$8 sps:$4 sm:$0xff]  }
  0x42   : > { %3227 = vmatprep.subr.bf16.mxu0 %v7222_v1  ;;  %1167 = vmatprep.subr.bf16.mxu1 %v7222_v1 }
  0x44   : > { %1168 = vmatpush1.bf16.msra.mxu1 %v6773_v33  ;;  %3228 = vmatpush1.bf16.msra.mxu0 %v6772_v35  ;;  %v7707_v33 = vld [vmem:[%s7370_s7 + $0x104] ss:$8 sps:$4 sm:$0xff]   ;;  %v6873_v35 = vld [vmem:[%s8625_s3 + $0x270] sm:$0xff]  }
  0x45   : > { %1169 = vmatprep.subr.bf16.mxu1 %v7222_v1  ;;  %3229 = vmatprep.subr.bf16.mxu0 %v7222_v1 }
  0x47   : > { %691 = vmatmul.mubr.bf16.gmra.mrb[4].mxu1 %v7447_v34  ;;  %2751 = vmatmul.mubr.bf16.gmra.mrb[4].mxu0 %v6771_v36  ;;  %v6878_v36 = vld [vmem:[%s8625_s3 + $0x278] sm:$0xff]  }
  0x48   : > { %5223 = vmatprep.mubr.msk.bf16.mxu1 %vm601_vm0, %v7460_v38  ;;  %3230 = vmatpush1.bf16.msra.mxu0 %v6774_v37  ;;  %v7722_v37 = vld [vmem:[%s7370_s7 + $0x100] ss:$8 sps:$4 sm:$0xff]  }
  0x49   : > { %5687 = vmatprep.mubr.msk.bf16.mxu0 %vm601_vm0, %v6777_v39  ;;  %3231 = vmatprep.subr.bf16.mxu0 %v7222_v1  ;;  %v7725_v39 = vld [vmem:[%s7370_s7 + $0x114] ss:$8 sps:$4 sm:$0xff]  }
  0x4a   : > { %1170 = vmatpush1.bf16.msra.mxu1 %v6784_v40  ;;  %v6849_v40 = vld [vmem:[%s7380_s12 + $0xd4] ss:$8 sps:$4 sm:$0xff]  }
  0x4b   : > { %1171 = vmatprep.subr.bf16.mxu1 %v7222_v1 }
  0x4c   : > { %3232 = vmatpush1.bf16.msra.mxu0 %v6781_v42  ;;  %v6886_v42 = vld [vmem:[%s8625_s3 + $0x280] sm:$0xff]  }
  0x4d   : > { %3233 = vmatprep.subr.bf16.mxu0 %v7222_v1 }
  0x4e   : > { %1172 = vmatpush1.bf16.msra.mxu1 %v6797_v44  ;;  %v7741_v44 = vld [vmem:[%s7370_s7 + $0x110] ss:$8 sps:$4 sm:$0xff]  }
  0x4f   : > { %699 = vmatmul.mubr.bf16.gmra.mrb[8].mxu1 %v7473_v41  ;;  %1173 = vmatprep.subr.bf16.mxu1 %v7222_v1 }
  0x50   : > { %2759 = vmatmul.mubr.bf16.gmra.mrb[8].mxu0 %v6780_v43  ;;  %5224 = vmatprep.mubr.msk.bf16.mxu1 %vm601_vm0, %v7484_v45  ;;  %v6891_v43 = vld [vmem:[%s8625_s3 + $0x288] sm:$0xff]  }
  0x51   : > { %5688 = vmatprep.mubr.msk.bf16.mxu0 %vm601_vm0, %v7488_v46  ;;  %3234 = vmatpush1.bf16.msra.mxu0 %v6789_v47  ;;  %v7745_v47 = vld [vmem:[%s7370_s7 + $0x124] ss:$8 sps:$4 sm:$0xff]  }
  0x52   : > { %3235 = vmatprep.subr.bf16.mxu0 %v7222_v1  ;;  %1174 = vmatpush1.bf16.msra.mxu1 %v6806_v48  ;;  %v6857_v48 = vld [vmem:[%s7380_s12 + $0xe4] ss:$8 sps:$4 sm:$0xff]  }
  0x53   : > { %1175 = vmatprep.subr.bf16.mxu1 %v7222_v1 }
  0x55   : > { %3236 = vmatpush1.bf16.msra.mxu0 %v6790_v50  ;;  %v6896_v50 = vld [vmem:[%s8625_s3 + $0x290] sm:$0xff]  }
  0x56   : > { %3237 = vmatprep.subr.bf16.mxu0 %v7222_v1  ;;  %1176 = vmatpush1.bf16.msra.mxu1 %v6817_v52  ;;  %v7761_v52 = vld [vmem:[%s7370_s7 + $0x120] ss:$8 sps:$4 sm:$0xff]  }
  0x57   : > { %707 = vmatmul.mubr.bf16.gmra.mrb[12].mxu1 %v7504_v49  ;;  %1177 = vmatprep.subr.bf16.mxu1 %v7222_v1 }
  0x58   : > { %2767 = vmatmul.mubr.bf16.gmra.mrb[12].mxu0 %v7510_v51  ;;  %5225 = vmatprep.mubr.msk.bf16.mxu1 %vm601_vm0, %v7517_v53 }
  0x59   : > { %5689 = vmatprep.mubr.msk.bf16.mxu0 %vm601_vm0, %v7521_v54  ;;  %3238 = vmatpush1.bf16.msra.mxu0 %v6798_v55  ;;  %v7765_v55 = vld [vmem:[%s7370_s7 + $0x134] ss:$8 sps:$4 sm:$0xff]  }
  0x5a   : > { %3239 = vmatprep.subr.bf16.mxu0 %v7222_v1  ;;  %1178 = vmatpush1.bf16.msra.mxu1 %v6827_v56  ;;  %v6864_v56 = vld [vmem:[%s7380_s12 + $0xf4] ss:$8 sps:$4 sm:$0xff]  }
  0x5b   : > { %1179 = vmatprep.subr.bf16.mxu1 %v7222_v1 }
  0x5d   : > { %3240 = vmatpush1.bf16.msra.mxu0 %v6805_v58  ;;  %v7775_v58 = vld [vmem:[%s7370_s7 + $0x130] ss:$8 sps:$4 sm:$0xff]  }
  0x5e   : > { %3241 = vmatprep.subr.bf16.mxu0 %v7222_v1  ;;  %1180 = vmatpush1.bf16.msra.mxu1 %v6832_v60  ;;  %v6869_v60 = vld [vmem:[%s7380_s12 + $0x104] ss:$8 sps:$4 sm:$0xff]  }
  0x5f   : > { %715 = vmatmul.mubr.bf16.gmra.mrb[16].mxu1 %v7538_v57  ;;  %1181 = vmatprep.subr.bf16.mxu1 %v7222_v1 }
  0x60   : > { %2775 = vmatmul.mubr.bf16.gmra.mrb[16].mxu0 %v7544_v59  ;;  %5226 = vmatprep.mubr.msk.bf16.mxu1 %vm601_vm0, %v7551_v61 }
  0x61   : > { %5690 = vmatprep.mubr.msk.bf16.mxu0 %vm601_vm0, %v7555_v62  ;;  %3242 = vmatpush1.bf16.msra.mxu0 %v6807_v63  ;;  %v6872_v63 = vld [vmem:[%s8625_s3 + $0xc0] sm:$0xff]  }
  0x62   : > { %3243 = vmatprep.subr.bf16.mxu0 %v7222_v1  ;;  %1182 = vmatpush1.bf16.msra.mxu1 %v6839_v0  ;;  %v6874_v0 = vld [vmem:[%s7380_s12 + $0x114] ss:$8 sps:$4 sm:$0xff]  }
  0x63   : > { %1183 = vmatprep.subr.bf16.mxu1 %v7222_v1 }
  0x65   : > { %3244 = vmatpush1.bf16.msra.mxu0 %v6814_v3  ;;  %v6877_v3 = vld [vmem:[%s8625_s3 + $0xc8] sm:$0xff]  }
  0x66   : > { %3245 = vmatprep.subr.bf16.mxu0 %v7222_v1  ;;  %1184 = vmatpush1.bf16.msra.mxu1 %v6845_v5  ;;  %v6881_v5 = vld [vmem:[%s7380_s12 + $0x120] ss:$8 sps:$4 sm:$0xff]  }
  0x67   : > { %723 = vmatmul.mubr.bf16.gmra.mrb[20].mxu1 %v7572_v2  ;;  %1185 = vmatprep.subr.bf16.mxu1 %v7222_v1 }
  0x68   : > { %2783 = vmatmul.mubr.bf16.gmra.mrb[20].mxu0 %v7578_v4  ;;  %5227 = vmatprep.mubr.msk.bf16.mxu1 %vm601_vm0, %v7585_v6 }
  0x69   : > { %5691 = vmatprep.mubr.msk.bf16.mxu0 %vm601_vm0, %v7589_v7  ;;  %3246 = vmatpush1.bf16.msra.mxu0 %v6822_v8  ;;  %v6885_v8 = vld [vmem:[%s7380_s12 + $0x130] ss:$8 sps:$4 sm:$0xff]  }
  0x6a   : > { %3247 = vmatprep.subr.bf16.mxu0 %v7222_v1  ;;  %1186 = vmatpush1.bf16.msra.mxu1 %v6853_v9  ;;  %v6887_v9 = vld [vmem:[%s7380_s12 + $0x144] ss:$8 sps:$4 sm:$0xff]  }
  0x6b   : > { %1187 = vmatprep.subr.bf16.mxu1 %v7222_v1 }
  0x6d   : > { %3248 = vmatpush1.bf16.msra.mxu0 %v6823_v10  ;;  %v6889_v10 = vld [vmem:[%s7380_s12 + $0x140] ss:$8 sps:$4 sm:$0xff]  }
  0x6e   : > { %3739 = vmatprep.subr.bf16.mxu0 %v7222_v1  ;;  %1188 = vmatpush1.bf16.msra.mxu1 %v6863_v11  ;;  %v6892_v11 = vld [vmem:[%s7380_s12 + $0x154] ss:$8 sps:$4 sm:$0xff]  }
  0x6f   : > { %731 = vmatmul.mubr.bf16.gmra.mrb[24].mxu1 %v7613_v12  ;;  %1680 = vmatprep.subr.bf16.mxu1 %v7222_v1 }
  0x70   : > { %2791 = vmatmul.mubr.bf16.gmra.mrb[24].mxu0 %v6813_v13  ;;  %5228 = vmatprep.mubr.msk.bf16.mxu1 %vm601_vm0, %v7618_v14 }
  0x71   : > { %5692 = vmatprep.mubr.msk.bf16.mxu0 %vm601_vm0, %v6818_v15 }
  0x77   : > { %739 = vmatmul.mubr.bf16.gmra.mrb[28].mxu1 %v7628_v16 }
  0x78   : > { %2799 = vmatmul.mubr.bf16.gmra.mrb[28].mxu0 %v6821_v17  ;;  %5229 = vmatprep.mubr.msk.bf16.mxu1 %vm601_vm0, %v7632_v18 }
  0x79   : > { %5801 = vmatprep.mubr.msk.bf16.mxu0 %vm601_vm0, %v7488_v46  ;;  %v6852_v46 = vld [vmem:[%s7380_s12 + $0xd0] ss:$8 sps:$4 sm:$0xff]  }
  0x7f   : > { %747 = vmatmul.mubr.bf16.gmra.mrb[32].mxu1 %v7640_v19 }
  0x80   : > { %3258 = vmatmul.mubr.bf16.vlgmr.msra.gmra.mrb[0].mxu0 %v7510_v51  ;;  %5230 = vmatprep.mubr.msk.bf16.mxu1 %vm601_vm0, %v7643_v20  ;;  %v6904_v51 = vld [vmem:[%s8625_s3 + $0x298] sm:$0xff]  }
  0x81   : > { %3740 = vmatpush1.bf16.msra.mxu0 %v6828_v21  ;;  %5802 = vmatprep.mubr.msk.bf16.mxu0 %vm601_vm0, %v7521_v54  ;;  %v6860_v54 = vld [vmem:[%s7380_s12 + $0xe0] ss:$8 sps:$4 sm:$0xff]   ;;  %v6901_v21 = vld [vmem:[%s7380_s12 + $0x174] ss:$8 sps:$4 sm:$0xff]  }
  0x82   : > { %3741 = vmatprep.subr.bf16.mxu0 %v7222_v1 }
  0x85   : > { %3742 = vmatpush1.bf16.msra.mxu0 %v6833_v23  ;;  %v6905_v23 = vld [vmem:[%s7652_s13] ss:$8 sps:$4 sm:$0xff]  }
  0x86   : > { %3743 = vmatprep.subr.bf16.mxu0 %v7222_v1 }
  0x87   : > { %755 = vmatmul.mubr.bf16.gmra.mrb[36].mxu1 %v7661_v22 }
  0x88   : > { %3266 = vmatmul.mubr.bf16.gmra.mrb[4].mxu0 %v7544_v59  ;;  %5231 = vmatprep.mubr.msk.bf16.mxu1 %vm601_vm0, %v7668_v24  ;;  %v6867_v59 = vld [vmem:[%s7380_s12 + $0xf0] ss:$8 sps:$4 sm:$0xff]  }
  0x89   : > { %5803 = vmatprep.mubr.msk.bf16.mxu0 %vm601_vm0, %v7555_v62  ;;  %3744 = vmatpush1.bf16.msra.mxu0 %v6841_v25  ;;  %v6871_v62 = vld [vmem:[%s7380_s12 + $0x100] ss:$8 sps:$4 sm:$0xff]   ;;  %v6915_v25 = vld [vmem:[%s7652_s13 + $0x24] ss:$8 sps:$4 sm:$0xff]  }
  0x8a   : > { %3745 = vmatprep.subr.bf16.mxu0 %v7222_v1 }
  0x8d   : > { %3746 = vmatpush1.bf16.msra.mxu0 %v6846_v26  ;;  %v6917_v26 = vld [vmem:[%s7652_s13 + $0x20] ss:$8 sps:$4 sm:$0xff]  }
  0x8e   : > { %3747 = vmatprep.subr.bf16.mxu0 %v7222_v1 }
  0x8f   : > { %763 = vmatmul.mubr.bf16.gmra.mrb[40].mxu1 %v7684_v27 }
  0x90   : > { %3274 = vmatmul.mubr.bf16.gmra.mrb[8].mxu0 %v7578_v4  ;;  %5232 = vmatprep.mubr.msk.bf16.mxu1 %vm601_vm0, %v7687_v28  ;;  %v6879_v4 = vld [vmem:[%s7380_s12 + $0x124] ss:$8 sps:$4 sm:$0xff]  }
  0x91   : > { %5804 = vmatprep.mubr.msk.bf16.mxu0 %vm601_vm0, %v7589_v7  ;;  %3748 = vmatpush1.bf16.msra.mxu0 %v6854_v29  ;;  %v6883_v7 = vld [vmem:[%s7380_s12 + $0x134] ss:$8 sps:$4 sm:$0xff]  }
  0x92   : > { %3749 = vmatprep.subr.bf16.mxu0 %v7222_v1  ;;  %v6919_v29 = vld [vmem:[%s7652_s13 + $0x34] ss:$8 sps:$4 sm:$0xff]  }
  0x95   : > { %3750 = vmatpush1.bf16.msra.mxu0 %v6868_v30  ;;  %v6921_v30 = vld [vmem:[%s7652_s13 + $0x30] ss:$8 sps:$4 sm:$0xff]  }
  0x96   : > { %3751 = vmatprep.subr.bf16.mxu0 %v7222_v1 }
  0x97   : > { %771 = vmatmul.mubr.bf16.gmra.mrb[44].mxu1 %v7704_v32 }
  0x98   : > { %3282 = vmatmul.mubr.bf16.gmra.mrb[12].mxu0 %v6813_v13  ;;  %5233 = vmatprep.mubr.msk.bf16.mxu1 %vm601_vm0, %v7707_v33  ;;  %v6894_v13 = vld [vmem:[%s7380_s12 + $0x150] ss:$8 sps:$4 sm:$0xff]  }
  0x99   : > { %5805 = vmatprep.mubr.msk.bf16.mxu0 %vm601_vm0, %v6818_v15  ;;  %3752 = vmatpush1.bf16.msra.mxu0 %v6873_v35  ;;  %v6897_v15 = vld [vmem:[%s7380_s12 + $0x164] ss:$8 sps:$4 sm:$0xff]  }
  0x9a   : > { %3753 = vmatprep.subr.bf16.mxu0 %v7222_v1  ;;  %v6923_v35 = vld [vmem:[%s7652_s13 + $0x44] ss:$8 sps:$4 sm:$0xff]  }
  0x9d   : > { %3754 = vmatpush1.bf16.msra.mxu0 %v6878_v36  ;;  %v6925_v36 = vld [vmem:[%s7652_s13 + $0x40] ss:$8 sps:$4 sm:$0xff]  }
  0x9e   : > { %3755 = vmatprep.subr.bf16.mxu0 %v7222_v1 }
  0x9f   : > { %779 = vmatmul.mubr.bf16.gmra.mrb[48].mxu1 %v7722_v37 }
  0xa0   : > { %3290 = vmatmul.mubr.bf16.gmra.mrb[16].mxu0 %v6821_v17  ;;  %5234 = vmatprep.mubr.msk.bf16.mxu1 %vm601_vm0, %v7725_v39  ;;  %v6899_v17 = vld [vmem:[%s7380_s12 + $0x160] ss:$8 sps:$4 sm:$0xff]  }
  0xa1   : > { %5806 = vmatprep.mubr.msk.bf16.mxu0 %vm601_vm0, %v6849_v40  ;;  %3756 = vmatpush1.bf16.msra.mxu0 %v6886_v42  ;;  %v7936_v40 = vld [vmem:[%s7652_s13 + $0x54] ss:$8 sps:$4 sm:$0xff]   ;;  %v7952_v42 = vld [vmem:[%s7652_s13 + $0x50] ss:$8 sps:$4 sm:$0xff]  }
  0xa2   : > { %3757 = vmatprep.subr.bf16.mxu0 %v7222_v1 }
  0xa5   : > { %3758 = vmatpush1.bf16.msra.mxu0 %v6891_v43  ;;  %v7955_v43 = vld [vmem:[%s7652_s13 + $0x64] ss:$8 sps:$4 sm:$0xff]  }
  0xa6   : > { %3759 = vmatprep.subr.bf16.mxu0 %v7222_v1 }
  0xa7   : > { %787 = vmatmul.mubr.bf16.gmra.mrb[52].mxu1 %v7741_v44 }
  0xa8   : > { %3298 = vmatmul.mubr.bf16.gmra.mrb[20].mxu0 %v6852_v46  ;;  %5235 = vmatprep.mubr.msk.bf16.mxu1 %vm601_vm0, %v7745_v47  ;;  %v7003_v46 = vld [vmem:[%s8625_s3 + $0x2f8] sm:$0xff]  }
  0xa9   : > { %5807 = vmatprep.mubr.msk.bf16.mxu0 %vm601_vm0, %v6857_v48  ;;  %3760 = vmatpush1.bf16.msra.mxu0 %v6896_v50  ;;  %v7975_v48 = vld [vmem:[%s7370_s7 + $0x144] ss:$8 sps:$4 sm:$0xff]   ;;  %v7978_v50 = vld [vmem:[%s7652_s13 + $0x74] ss:$8 sps:$4 sm:$0xff]  }
  0xaa   : > { %3761 = vmatprep.subr.bf16.mxu0 %v7222_v1 }
  0xad   : > { %3762 = vmatpush1.bf16.msra.mxu0 %v6904_v51  ;;  %v7988_v51 = vld [vmem:[%s7370_s7 + $0x140] ss:$8 sps:$4 sm:$0xff]  }
  0xae   : > { %4254 = vmatprep.subr.bf16.mxu0 %v7222_v1 }
  0xaf   : > { %795 = vmatmul.mubr.bf16.gmra.mrb[56].mxu1 %v7761_v52 }
  0xb0   : > { %3306 = vmatmul.mubr.bf16.gmra.mrb[24].mxu0 %v6860_v54  ;;  %5236 = vmatprep.mubr.msk.bf16.mxu1 %vm601_vm0, %v7765_v55  ;;  %v6946_v54 = vld [vmem:[%s7370_s7 + $0x64] ss:$8 sps:$4 sm:$0xff]  }
  0xb1   : > { %5808 = vmatprep.mubr.msk.bf16.mxu0 %vm601_vm0, %v6864_v56  ;;  %v6944_v56 = vld [vmem:[%s7370_s7 + $0x60] ss:$8 sps:$4 sm:$0xff]  }
  0xb7   : > { %803 = vmatmul.mubr.bf16.gmra.mrb[60].mxu1 %v7775_v58 }
  0xb8   : > { %3314 = vmatmul.mubr.bf16.gmra.mrb[28].mxu0 %v6867_v59  ;;  %5337 = vmatprep.mubr.msk.bf16.mxu1 %vm601_vm0, %v7437_v31  ;;  %v6876_v31 = vld [vmem:[%s7380_s12 + $0x110] ss:$8 sps:$4 sm:$0xff]   ;;  %v6950_v59 = vld [vmem:[%s8625_s3 + $0x120] sm:$0xff]  }
  0xb9   : > { %5809 = vmatprep.mubr.msk.bf16.mxu0 %vm601_vm0, %v6869_v60  ;;  %v6952_v60 = vld [vmem:[%s7370_s7 + $0x74] ss:$8 sps:$4 sm:$0xff]  }
  0xbf   : > { %1198 = vmatmul.mubr.bf16.vlgmr.msra.gmra.mrb[0].mxu1 %v7447_v34  ;;  %v6882_v34 = vld [vmem:[%s8625_s3 + $0xd0] sm:$0xff]  }
  0xc0   : > { %3322 = vmatmul.mubr.bf16.gmra.mrb[32].mxu0 %v6871_v62  ;;  %1681 = vmatpush1.bf16.msra.mxu1 %v6872_v63  ;;  %v8011_v62 = vld [vmem:[%s7652_s13 + $0x94] ss:$8 sps:$4 sm:$0xff]   ;;  %v6958_v63 = vld [vmem:[%s8625_s3 + $0x128] sm:$0xff]  }
  0xc1   : > { %5338 = vmatprep.mubr.msk.bf16.mxu1 %vm601_vm0, %v7460_v38  ;;  %5810 = vmatprep.mubr.msk.bf16.mxu0 %vm601_vm0, %v6874_v0  ;;  %v6890_v38 = vld [vmem:[%s8625_s3 + $0xd8] sm:$0xff]  }
  0xc2   : > { %1682 = vmatprep.subr.bf16.mxu1 %v7222_v1  ;;  %v6956_v0 = vld [vmem:[%s7370_s7 + $0x70] ss:$8 sps:$4 sm:$0xff]  }
  0xc4   : > { %1683 = vmatpush1.bf16.msra.mxu1 %v6877_v3  ;;  %v8023_v3 = vld [vmem:[%s7652_s13 + $0x90] ss:$8 sps:$4 sm:$0xff]  }
  0xc5   : > { %1684 = vmatprep.subr.bf16.mxu1 %v7222_v1 }
  0xc7   : > { %1206 = vmatmul.mubr.bf16.gmra.mrb[4].mxu1 %v7473_v41  ;;  %v6895_v41 = vld [vmem:[%s8625_s3 + $0xe0] sm:$0xff]  }
  0xc8   : > { %3330 = vmatmul.mubr.bf16.gmra.mrb[36].mxu0 %v6876_v31  ;;  %5339 = vmatprep.mubr.msk.bf16.mxu1 %vm601_vm0, %v7484_v45  ;;  %v6900_v45 = vld [vmem:[%s8625_s3 + $0xe8] sm:$0xff]  }
  0xc9   : > { %5811 = vmatprep.mubr.msk.bf16.mxu0 %vm601_vm0, %v6879_v4  ;;  %1685 = vmatpush1.bf16.msra.mxu1 %v6882_v34  ;;  %v6960_v31 = vld [vmem:[%s7370_s7 + $0x84] ss:$8 sps:$4 sm:$0xff]   ;;  %v6968_v34 = vld [vmem:[%s8625_s3 + $0x130] sm:$0xff]  }
  0xca   : > { %1686 = vmatprep.subr.bf16.mxu1 %v7222_v1  ;;  %v8027_v4 = vld [vmem:[%s7652_s13 + $0xa4] ss:$8 sps:$4 sm:$0xff]  }
  0xcd   : > { %1687 = vmatpush1.bf16.msra.mxu1 %v6890_v38  ;;  %v6980_v38 = vld [vmem:[%s8625_s3 + $0x138] sm:$0xff]  }
  0xce   : > { %1688 = vmatprep.subr.bf16.mxu1 %v7222_v1 }
  0xcf   : > { %1214 = vmatmul.mubr.bf16.gmra.mrb[8].mxu1 %v7504_v49  ;;  %v6908_v49 = vld [vmem:[%s8625_s3 + $0xf0] sm:$0xff]  }
  0xd0   : > { %3338 = vmatmul.mubr.bf16.gmra.mrb[40].mxu0 %v6881_v5  ;;  %5340 = vmatprep.mubr.msk.bf16.mxu1 %vm601_vm0, %v7517_v53  ;;  %v6913_v53 = vld [vmem:[%s8625_s3 + $0xf8] sm:$0xff]   ;;  %v6964_v5 = vld [vmem:[%s7370_s7 + $0x80] ss:$8 sps:$4 sm:$0xff]  }
  0xd1   : > { %5812 = vmatprep.mubr.msk.bf16.mxu0 %vm601_vm0, %v6883_v7  ;;  %1689 = vmatpush1.bf16.msra.mxu1 %v6895_v41  ;;  %v8043_v7 = vld [vmem:[%s7652_s13 + $0xa0] ss:$8 sps:$4 sm:$0xff]   ;;  %v6966_v41 = vld [vmem:[%s7370_s7 + $0x94] ss:$8 sps:$4 sm:$0xff]  }
  0xd2   : > { %1690 = vmatprep.subr.bf16.mxu1 %v7222_v1 }
  0xd5   : > { %1691 = vmatpush1.bf16.msra.mxu1 %v6900_v45  ;;  %v8047_v45 = vld [vmem:[%s7652_s13 + $0xb4] ss:$8 sps:$4 sm:$0xff]  }
  0xd6   : > { %1692 = vmatprep.subr.bf16.mxu1 %v7222_v1 }
  0xd7   : > { %1222 = vmatmul.mubr.bf16.gmra.mrb[12].mxu1 %v7538_v57  ;;  %v6918_v57 = vld [vmem:[%s8625_s3 + $0x100] sm:$0xff]  }
  0xd8   : > { %3346 = vmatmul.mubr.bf16.gmra.mrb[44].mxu0 %v6885_v8  ;;  %5341 = vmatprep.mubr.msk.bf16.mxu1 %vm601_vm0, %v7551_v61  ;;  %v6926_v61 = vld [vmem:[%s8625_s3 + $0x108] sm:$0xff]   ;;  %v6988_v8 = vld [vmem:[%s8625_s3 + $0x140] sm:$0xff]  }
  0xd9   : > { %5813 = vmatprep.mubr.msk.bf16.mxu0 %vm601_vm0, %v6887_v9  ;;  %1693 = vmatpush1.bf16.msra.mxu1 %v6908_v49  ;;  %v6998_v9 = vld [vmem:[%s8625_s3 + $0x148] sm:$0xff]   ;;  %v6971_v49 = vld [vmem:[%s7370_s7 + $0x90] ss:$8 sps:$4 sm:$0xff]  }
  0xda   : > { %1694 = vmatprep.subr.bf16.mxu1 %v7222_v1 }
  0xdd   : > { %1695 = vmatpush1.bf16.msra.mxu1 %v6913_v53  ;;  %v8063_v53 = vld [vmem:[%s7652_s13 + $0xb0] ss:$8 sps:$4 sm:$0xff]  }
  0xde   : > { %1696 = vmatprep.subr.bf16.mxu1 %v7222_v1 }
  0xdf   : > { %1230 = vmatmul.mubr.bf16.gmra.mrb[16].mxu1 %v7572_v2  ;;  %v6931_v2 = vld [vmem:[%s8625_s3 + $0x110] sm:$0xff]  }
  0xe0   : > { %3354 = vmatmul.mubr.bf16.gmra.mrb[48].mxu0 %v6889_v10  ;;  %5342 = vmatprep.mubr.msk.bf16.mxu1 %vm601_vm0, %v7585_v6  ;;  %v6938_v6 = vld [vmem:[%s8625_s3 + $0x118] sm:$0xff]   ;;  %v6974_v10 = vld [vmem:[%s7370_s7 + $0xa4] ss:$8 sps:$4 sm:$0xff]  }
  0xe1   : > { %5814 = vmatprep.mubr.msk.bf16.mxu0 %vm601_vm0, %v6892_v11  ;;  %1697 = vmatpush1.bf16.msra.mxu1 %v6918_v57  ;;  %v8067_v11 = vld [vmem:[%s7652_s13 + $0xc4] ss:$8 sps:$4 sm:$0xff]   ;;  %v7007_v57 = vld [vmem:[%s8625_s3 + $0x150] sm:$0xff]  }
  0xe2   : > { %1698 = vmatprep.subr.bf16.mxu1 %v7222_v1 }
  0xe5   : > { %1699 = vmatpush1.bf16.msra.mxu1 %v6926_v61  ;;  %v7012_v61 = vld [vmem:[%s8625_s3 + $0x158] sm:$0xff]  }
  0xe6   : > { %1700 = vmatprep.subr.bf16.mxu1 %v7222_v1 }
  0xe7   : > { %1238 = vmatmul.mubr.bf16.gmra.mrb[20].mxu1 %v7613_v12  ;;  %v6903_v12 = vld [vmem:[%s7380_s12 + $0x170] ss:$8 sps:$4 sm:$0xff]  }
  0xe8   : > { %3362 = vmatmul.mubr.bf16.gmra.mrb[52].mxu0 %v6894_v13  ;;  %5343 = vmatprep.mubr.msk.bf16.mxu1 %vm601_vm0, %v7618_v14  ;;  %v6907_v14 = vld [vmem:[%s7652_s13 + $0x4] ss:$8 sps:$4 sm:$0xff]   ;;  %v6978_v13 = vld [vmem:[%s7370_s7 + $0xa0] ss:$8 sps:$4 sm:$0xff]  }
  0xe9   : > { %5815 = vmatprep.mubr.msk.bf16.mxu0 %vm601_vm0, %v6897_v15  ;;  %1701 = vmatpush1.bf16.msra.mxu1 %v6931_v2  ;;  %v8083_v15 = vld [vmem:[%s7652_s13 + $0xc0] ss:$8 sps:$4 sm:$0xff]   ;;  %v6982_v2 = vld [vmem:[%s7370_s7 + $0xb4] ss:$8 sps:$4 sm:$0xff]  }
  0xea   : > { %1702 = vmatprep.subr.bf16.mxu1 %v7222_v1 }
  0xed   : > { %1703 = vmatpush1.bf16.msra.mxu1 %v6938_v6  ;;  %v8087_v6 = vld [vmem:[%s7652_s13 + $0xd4] ss:$8 sps:$4 sm:$0xff]  }
  0xee   : > { %2195 = vmatprep.subr.bf16.mxu1 %v7222_v1 }
  0xef   : > { %1246 = vmatmul.mubr.bf16.gmra.mrb[24].mxu1 %v7628_v16  ;;  %v6909_v16 = vld [vmem:[%s8625_s3 + $0x2a0] sm:$0xff]  }
  0xf0   : > { %3370 = vmatmul.mubr.bf16.gmra.mrb[56].mxu0 %v6899_v17  ;;  %5344 = vmatprep.mubr.msk.bf16.mxu1 %vm601_vm0, %v7632_v18  ;;  %v6910_v18 = vld [vmem:[%s7652_s13 + $0x14] ss:$8 sps:$4 sm:$0xff]   ;;  %v7019_v17 = vld [vmem:[%s8625_s3 + $0x160] sm:$0xff]  }
  0xf1   : > { %5816 = vmatprep.mubr.msk.bf16.mxu0 %vm601_vm0, %v6901_v21  ;;  %v7025_v21 = vld [vmem:[%s8625_s3 + $0x168] sm:$0xff]  }
  0xf7   : > { %1254 = vmatmul.mubr.bf16.gmra.mrb[28].mxu1 %v7640_v19  ;;  %v6914_v19 = vld [vmem:[%s8625_s3 + $0x2a8] sm:$0xff]  }
  0xf8   : > { %3378 = vmatmul.mubr.bf16.gmra.mrb[60].mxu0 %v6903_v12  ;;  %5345 = vmatprep.mubr.msk.bf16.mxu1 %vm601_vm0, %v7643_v20  ;;  %v6912_v20 = vld [vmem:[%s7652_s13 + $0x10] ss:$8 sps:$4 sm:$0xff]  }
  0xf9   : > { %5885 = vmatprep.mubr.msk.bf16.mxu0 %vm601_vm0, %v6907_v14  ;;  %v6986_v12 = vld [vmem:[%s7370_s7 + $0xb0] ss:$8 sps:$4 sm:$0xff]  }
  0xfa   : > { %v8103_v14 = vld [vmem:[%s7652_s13 + $0xd0] ss:$8 sps:$4 sm:$0xff]  }
  0xff   : > { %1262 = vmatmul.mubr.bf16.gmra.mrb[32].mxu1 %v7661_v22  ;;  %v6922_v22 = vld [vmem:[%s8625_s3 + $0x2b0] sm:$0xff]  }
 0x100   : > { %3772 = vmatmul.mubr.bf16.vlgmr.msra.gmra.mrb[0].mxu0 %v6905_v23  ;;  %5346 = vmatprep.mubr.msk.bf16.mxu1 %vm601_vm0, %v7668_v24  ;;  %v6927_v24 = vld [vmem:[%s8625_s3 + $0x2b8] sm:$0xff]   ;;  %v6990_v23 = vld [vmem:[%s7370_s7 + $0xc4] ss:$8 sps:$4 sm:$0xff]  }
 0x101   : > { %4255 = vmatpush1.bf16.msra.mxu0 %v6909_v16  ;;  %5886 = vmatprep.mubr.msk.bf16.mxu0 %vm601_vm0, %v6910_v18  ;;  %v8107_v16 = vld [vmem:[%s7652_s13 + $0xe4] ss:$8 sps:$4 sm:$0xff]   ;;  %v7030_v18 = vld [vmem:[%s8625_s3 + $0x170] sm:$0xff]  }
 0x102   : > { %4256 = vmatprep.subr.bf16.mxu0 %v7222_v1 }
 0x105   : > { %4257 = vmatpush1.bf16.msra.mxu0 %v6914_v19  ;;  %v7034_v19 = vld [vmem:[%s8625_s3 + $0x178] sm:$0xff]  }
 0x106   : > { %4258 = vmatprep.subr.bf16.mxu0 %v7222_v1 }
 0x107   : > { %1270 = vmatmul.mubr.bf16.gmra.mrb[36].mxu1 %v7684_v27  ;;  %v6932_v27 = vld [vmem:[%s8625_s3 + $0x2c0] sm:$0xff]  }
 0x108   : > { %3780 = vmatmul.mubr.bf16.gmra.mrb[4].mxu0 %v6912_v20  ;;  %5347 = vmatprep.mubr.msk.bf16.mxu1 %vm601_vm0, %v7687_v28  ;;  %v6943_v28 = vld [vmem:[%s8625_s3 + $0x2c8] sm:$0xff]  }
 0x109   : > { %5887 = vmatprep.mubr.msk.bf16.mxu0 %vm601_vm0, %v6915_v25  ;;  %4259 = vmatpush1.bf16.msra.mxu0 %v6922_v22  ;;  %v6994_v20 = vld [vmem:[%s7370_s7 + $0xc0] ss:$8 sps:$4 sm:$0xff]   ;;  %v6996_v22 = vld [vmem:[%s7370_s7 + $0xd4] ss:$8 sps:$4 sm:$0xff]  }
 0x10a   : > { %4260 = vmatprep.subr.bf16.mxu0 %v7222_v1  ;;  %v8123_v25 = vld [vmem:[%s7652_s13 + $0xe0] ss:$8 sps:$4 sm:$0xff]  }
 0x10d   : > { %4261 = vmatpush1.bf16.msra.mxu0 %v6927_v24  ;;  %v8127_v24 = vld [vmem:[%s7652_s13 + $0xf4] ss:$8 sps:$4 sm:$0xff]  }
 0x10e   : > { %4262 = vmatprep.subr.bf16.mxu0 %v7222_v1 }
 0x10f   : > { %1278 = vmatmul.mubr.bf16.gmra.mrb[40].mxu1 %v7704_v32  ;;  %v6951_v32 = vld [vmem:[%s8625_s3 + $0x2d0] sm:$0xff]  }
 0x110   : > { %3788 = vmatmul.mubr.bf16.gmra.mrb[8].mxu0 %v6917_v26  ;;  %5348 = vmatprep.mubr.msk.bf16.mxu1 %vm601_vm0, %v7707_v33  ;;  %v6959_v33 = vld [vmem:[%s8625_s3 + $0x2d8] sm:$0xff]  }
 0x111   : > { %5888 = vmatprep.mubr.msk.bf16.mxu0 %vm601_vm0, %v6919_v29  ;;  %4263 = vmatpush1.bf16.msra.mxu0 %v6932_v27  ;;  %v7001_v26 = vld [vmem:[%s7370_s7 + $0xd0] ss:$8 sps:$4 sm:$0xff]   ;;  %v7004_v27 = vld [vmem:[%s7370_s7 + $0xe4] ss:$8 sps:$4 sm:$0xff]  }
 0x112   : > { %4264 = vmatprep.subr.bf16.mxu0 %v7222_v1  ;;  %v8136_v29 = vld [vmem:[%s7652_s13 + $0xf0] ss:$8 sps:$4 sm:$0xff]  }
 0x115   : > { %4265 = vmatpush1.bf16.msra.mxu0 %v6943_v28  ;;  %v7006_v28 = vld [vmem:[%s7370_s7 + $0xe0] ss:$8 sps:$4 sm:$0xff]  }
 0x116   : > { %4266 = vmatprep.subr.bf16.mxu0 %v7222_v1 }
 0x117   : > { %1286 = vmatmul.mubr.bf16.gmra.mrb[44].mxu1 %v7722_v37  ;;  %v6973_v37 = vld [vmem:[%s8625_s3 + $0x2e0] sm:$0xff]  }
 0x118   : > { %3796 = vmatmul.mubr.bf16.gmra.mrb[12].mxu0 %v6921_v30  ;;  %5349 = vmatprep.mubr.msk.bf16.mxu1 %vm601_vm0, %v7725_v39  ;;  %v6981_v39 = vld [vmem:[%s8625_s3 + $0x2e8] sm:$0xff]   ;;  %v7009_v30 = vld [vmem:[%s7370_s7 + $0xf4] ss:$8 sps:$4 sm:$0xff]  }
 0x119   : > { %5889 = vmatprep.mubr.msk.bf16.mxu0 %vm601_vm0, %v6923_v35  ;;  %4267 = vmatpush1.bf16.msra.mxu0 %v6951_v32  ;;  %v7008_v35 = vld [vmem:[%s8625_s3 + $0x300] sm:$0xff]   ;;  %v7013_v32 = vld [vmem:[%s8625_s3 + $0x308] sm:$0xff]  }
 0x11a   : > { %4268 = vmatprep.subr.bf16.mxu0 %v7222_v1 }
 0x11d   : > { %4269 = vmatpush1.bf16.msra.mxu0 %v6959_v33  ;;  %v7011_v33 = vld [vmem:[%s7370_s7 + $0xf0] ss:$8 sps:$4 sm:$0xff]  }
 0x11e   : > { %4270 = vmatprep.subr.bf16.mxu0 %v7222_v1 }
 0x11f   : > { %1294 = vmatmul.mubr.bf16.gmra.mrb[48].mxu1 %v7741_v44  ;;  %v6989_v44 = vld [vmem:[%s8625_s3 + $0x2f0] sm:$0xff]  }
 0x120   : > { %3804 = vmatmul.mubr.bf16.gmra.mrb[16].mxu0 %v6925_v36  ;;  %5350 = vmatprep.mubr.msk.bf16.mxu1 %vm601_vm0, %v7745_v47  ;;  %v7972_v47 = vld [vmem:[%s7652_s13 + $0x60] ss:$8 sps:$4 sm:$0xff]   ;;  %v7014_v36 = vld [vmem:[%s7370_s7 + $0x104] ss:$8 sps:$4 sm:$0xff]  }
 0x121   : > { %5890 = vmatprep.mubr.msk.bf16.mxu0 %vm601_vm0, %v7936_v40  ;;  %4271 = vmatpush1.bf16.msra.mxu0 %v6973_v37  ;;  %v7026_v37 = vld [vmem:[%s8625_s3 + $0x318] sm:$0xff]  }
 0x122   : > { %4272 = vmatprep.subr.bf16.mxu0 %v7222_v1 }
 0x125   : > { %4273 = vmatpush1.bf16.msra.mxu0 %v6981_v39  ;;  %v7016_v39 = vld [vmem:[%s7370_s7 + $0x100] ss:$8 sps:$4 sm:$0xff]  }
 0x126   : > { %4274 = vmatprep.subr.bf16.mxu0 %v7222_v1 }
 0x127   : > { %1302 = vmatmul.mubr.bf16.gmra.mrb[52].mxu1 %v7761_v52  ;;  %v7991_v52 = vld [vmem:[%s7652_s13 + $0x70] ss:$8 sps:$4 sm:$0xff]  }
 0x128   : > { %3812 = vmatmul.mubr.bf16.gmra.mrb[20].mxu0 %v7952_v42  ;;  %5351 = vmatprep.mubr.msk.bf16.mxu1 %vm601_vm0, %v7765_v55  ;;  %v7995_v55 = vld [vmem:[%s7652_s13 + $0x84] ss:$8 sps:$4 sm:$0xff]  }
 0x129   : > { %5891 = vmatprep.mubr.msk.bf16.mxu0 %vm601_vm0, %v7955_v43  ;;  %4275 = vmatpush1.bf16.msra.mxu0 %v6989_v44  ;;  %v7036_v44 = vld [vmem:[%s8625_s3 + $0x328] sm:$0xff]  }
 0x12a   : > { %4276 = vmatprep.subr.bf16.mxu0 %v7222_v1 }
 0x12d   : > { %4277 = vmatpush1.bf16.msra.mxu0 %v7003_v46  ;;  %v7020_v46 = vld [vmem:[%s7370_s7 + $0x110] ss:$8 sps:$4 sm:$0xff]  }
 0x12e   : > { %4769 = vmatprep.subr.bf16.mxu0 %v7222_v1 }
 0x12f   : > { %1310 = vmatmul.mubr.bf16.gmra.mrb[56].mxu1 %v7775_v58  ;;  %v8004_v58 = vld [vmem:[%s7652_s13 + $0x80] ss:$8 sps:$4 sm:$0xff]  }
 0x130   : > { %3820 = vmatmul.mubr.bf16.gmra.mrb[24].mxu0 %v7972_v47  ;;  %5352 = vmatprep.mubr.msk.bf16.mxu1 %vm601_vm0, %v7975_v48 }
 0x131   : > { %5892 = vmatprep.mubr.msk.bf16.mxu0 %vm601_vm0, %v7978_v50 }
 0x137   : > { %1318 = vmatmul.mubr.bf16.gmra.mrb[60].mxu1 %v7988_v51 }
 0x138   : > { %3828 = vmatmul.mubr.bf16.gmra.mrb[28].mxu0 %v7991_v52  ;;  %5453 = vmatprep.mubr.msk.bf16.mxu1 %vm601_vm0, %v6946_v54  ;;  %v7024_v54 = vld [vmem:[%s7370_s7 + $0x120] ss:$8 sps:$4 sm:$0xff]  }
 0x139   : > { %5893 = vmatprep.mubr.msk.bf16.mxu0 %vm601_vm0, %v7995_v55 }
 0x13f   : > { %1713 = vmatmul.mubr.bf16.vlgmr.msra.gmra.mrb[0].mxu1 %v6944_v56  ;;  %v7054_v56 = vld [vmem:[%s8625_s3 + $0x340] sm:$0xff]  }
 0x140   : > { %3836 = vmatmul.mubr.bf16.gmra.mrb[32].mxu0 %v8004_v58  ;;  %2196 = vmatpush1.bf16.msra.mxu1 %v6950_v59  ;;  %v7029_v59 = vld [vmem:[%s7370_s7 + $0x130] ss:$8 sps:$4 sm:$0xff]  }
 0x141   : > { %5454 = vmatprep.mubr.msk.bf16.mxu1 %vm601_vm0, %v6952_v60  ;;  %5894 = vmatprep.mubr.msk.bf16.mxu0 %vm601_vm0, %v8011_v62  ;;  %v7068_v60 = vld [vmem:[%s8625_s3 + $0x350] sm:$0xff]  }
 0x142   : > { %2197 = vmatprep.subr.bf16.mxu1 %v7222_v1 }
 0x144   : > { %2198 = vmatpush1.bf16.msra.mxu1 %v6958_v63  ;;  %v7032_v63 = vld [vmem:[%s7370_s7 + $0x154] ss:$8 sps:$4 sm:$0xff]  }
 0x145   : > { %2199 = vmatprep.subr.bf16.mxu1 %v7222_v1 }
 0x147   : > { %1721 = vmatmul.mubr.bf16.gmra.mrb[4].mxu1 %v6956_v0  ;;  %v7039_v0 = vld [vmem:[%s7380_s12 + $0x24] ss:$8 sps:$4 sm:$0xff]  }
 0x148   : > { %3844 = vmatmul.mubr.bf16.gmra.mrb[36].mxu0 %v8023_v3  ;;  %5455 = vmatprep.mubr.msk.bf16.mxu1 %vm601_vm0, %v6960_v31  ;;  %v7130_v31 = vld [vmem:[%s8625_s3 + $0x180] sm:$0xff]  }
 0x149   : > { %5895 = vmatprep.mubr.msk.bf16.mxu0 %vm601_vm0, %v8027_v4  ;;  %2200 = vmatpush1.bf16.msra.mxu1 %v6968_v34  ;;  %v7043_v34 = vld [vmem:[%s7380_s12 + $0x30] ss:$8 sps:$4 sm:$0xff]  }
 0x14a   : > { %2201 = vmatprep.subr.bf16.mxu1 %v7222_v1 }
 0x14d   : > { %2202 = vmatpush1.bf16.msra.mxu1 %v6980_v38  ;;  %v7131_v38 = vld [vmem:[%s8625_s3 + $0x188] sm:$0xff]  }
 0x14e   : > { %2203 = vmatprep.subr.bf16.mxu1 %v7222_v1 }
 0x14f   : > { %1729 = vmatmul.mubr.bf16.gmra.mrb[8].mxu1 %v6964_v5  ;;  %v7045_v5 = vld [vmem:[%s7380_s12 + $0x44] ss:$8 sps:$4 sm:$0xff]  }
 0x150   : > { %3852 = vmatmul.mubr.bf16.gmra.mrb[40].mxu0 %v8043_v7  ;;  %5456 = vmatprep.mubr.msk.bf16.mxu1 %vm601_vm0, %v6966_v41  ;;  %v7132_v41 = vld [vmem:[%s8625_s3 + $0x190] sm:$0xff]  }
 0x151   : > { %5896 = vmatprep.mubr.msk.bf16.mxu0 %vm601_vm0, %v8047_v45  ;;  %2204 = vmatpush1.bf16.msra.mxu1 %v6988_v8  ;;  %v7047_v8 = vld [vmem:[%s7380_s12 + $0x40] ss:$8 sps:$4 sm:$0xff]  }
 0x152   : > { %2205 = vmatprep.subr.bf16.mxu1 %v7222_v1 }
 0x155   : > { %2206 = vmatpush1.bf16.msra.mxu1 %v6998_v9  ;;  %v7048_v9 = vld [vmem:[%s7380_s12 + $0x54] ss:$8 sps:$4 sm:$0xff]  }
 0x156   : > { %2207 = vmatprep.subr.bf16.mxu1 %v7222_v1 }
 0x157   : > { %1737 = vmatmul.mubr.bf16.gmra.mrb[12].mxu1 %v6971_v49  ;;  %v8265_v49 = vld [vmem:[%s7652_s13 + $0x104] ss:$8 sps:$4 sm:$0xff]  }
 0x158   : > { %3860 = vmatmul.mubr.bf16.gmra.mrb[44].mxu0 %v8063_v53  ;;  %5457 = vmatprep.mubr.msk.bf16.mxu1 %vm601_vm0, %v6974_v10  ;;  %v7133_v10 = vld [vmem:[%s8625_s3 + $0x198] sm:$0xff]  }
 0x159   : > { %5897 = vmatprep.mubr.msk.bf16.mxu0 %vm601_vm0, %v8067_v11  ;;  %2208 = vmatpush1.bf16.msra.mxu1 %v7007_v57  ;;  %v7134_v57 = vld [vmem:[%s8625_s3 + $0x1a0] sm:$0xff]  }
 0x15a   : > { %2209 = vmatprep.subr.bf16.mxu1 %v7222_v1 }
 0x15d   : > { %2210 = vmatpush1.bf16.msra.mxu1 %v7012_v61  ;;  %v7052_v61 = vld [vmem:[%s7380_s12 + $0x50] ss:$8 sps:$4 sm:$0xff]  }
 0x15e   : > { %2211 = vmatprep.subr.bf16.mxu1 %v7222_v1 }
 0x15f   : > { %1745 = vmatmul.mubr.bf16.gmra.mrb[16].mxu1 %v6978_v13  ;;  %v8281_v13 = vld [vmem:[%s7652_s13 + $0x100] ss:$8 sps:$4 sm:$0xff]  }
 0x160   : > { %3868 = vmatmul.mubr.bf16.gmra.mrb[48].mxu0 %v8083_v15  ;;  %5458 = vmatprep.mubr.msk.bf16.mxu1 %vm601_vm0, %v6982_v2  ;;  %v7055_v2 = vld [vmem:[%s7380_s12 + $0x64] ss:$8 sps:$4 sm:$0xff]  }
 0x161   : > { %5898 = vmatprep.mubr.msk.bf16.mxu0 %vm601_vm0, %v8087_v6  ;;  %2212 = vmatpush1.bf16.msra.mxu1 %v7019_v17  ;;  %v8285_v17 = vld [vmem:[%s7652_s13 + $0x114] ss:$8 sps:$4 sm:$0xff]  }
 0x162   : > { %2213 = vmatprep.subr.bf16.mxu1 %v7222_v1 }
 0x165   : > { %2214 = vmatpush1.bf16.msra.mxu1 %v7025_v21  ;;  %v7135_v21 = vld [vmem:[%s8625_s3 + $0x1a8] sm:$0xff]  }
 0x166   : > { %2215 = vmatprep.subr.bf16.mxu1 %v7222_v1 }
 0x167   : > { %1753 = vmatmul.mubr.bf16.gmra.mrb[20].mxu1 %v6986_v12  ;;  %v7136_v12 = vld [vmem:[%s8625_s3 + $0x1b0] sm:$0xff]  }
 0x168   : > { %3876 = vmatmul.mubr.bf16.gmra.mrb[52].mxu0 %v8103_v14  ;;  %5459 = vmatprep.mubr.msk.bf16.mxu1 %vm601_vm0, %v6990_v23  ;;  %v7059_v23 = vld [vmem:[%s7380_s12 + $0x60] ss:$8 sps:$4 sm:$0xff]  }
 0x169   : > { %5899 = vmatprep.mubr.msk.bf16.mxu0 %vm601_vm0, %v8107_v16  ;;  %2216 = vmatpush1.bf16.msra.mxu1 %v7030_v18  ;;  %v8301_v18 = vld [vmem:[%s7652_s13 + $0x110] ss:$8 sps:$4 sm:$0xff]  }
 0x16a   : > { %2217 = vmatprep.subr.bf16.mxu1 %v7222_v1 }
 0x16d   : > { %2218 = vmatpush1.bf16.msra.mxu1 %v7034_v19  ;;  %v7062_v19 = vld [vmem:[%s7380_s12 + $0x74] ss:$8 sps:$4 sm:$0xff]  }
 0x16e   : > { %6139 = vmatprep.subr.bf16.mxu1 %v7222_v1 }
 0x16f   : > { %1761 = vmatmul.mubr.bf16.gmra.mrb[24].mxu1 %v6994_v20  ;;  %v8305_v20 = vld [vmem:[%s7652_s13 + $0x124] ss:$8 sps:$4 sm:$0xff]  }
 0x170   : > { %3884 = vmatmul.mubr.bf16.gmra.mrb[56].mxu0 %v8123_v25  ;;  %5460 = vmatprep.mubr.msk.bf16.mxu1 %vm601_vm0, %v6996_v22  ;;  %v7137_v22 = vld [vmem:[%s8625_s3 + $0x1b8] sm:$0xff]  }
 0x171   : > { %5900 = vmatprep.mubr.msk.bf16.mxu0 %vm601_vm0, %v8127_v24 }
 0x177   : > { %1769 = vmatmul.mubr.bf16.gmra.mrb[28].mxu1 %v7001_v26  ;;  %v7138_v26 = vld [vmem:[%s8625_s3 + $0x1c0] sm:$0xff]  }
 0x178   : > { %3892 = vmatmul.mubr.bf16.gmra.mrb[60].mxu0 %v8136_v29  ;;  %5461 = vmatprep.mubr.msk.bf16.mxu1 %vm601_vm0, %v7004_v27  ;;  %v7066_v27 = vld [vmem:[%s7380_s12 + $0x70] ss:$8 sps:$4 sm:$0xff]  }
 0x179   : > { %6001 = vmatprep.mubr.msk.bf16.mxu0 %vm601_vm0, %v7936_v40  ;;  %v7021_v40 = vld [vmem:[%s8625_s3 + $0x310] sm:$0xff]  }
 0x17f   : > { %1777 = vmatmul.mubr.bf16.gmra.mrb[32].mxu1 %v7006_v28  ;;  %v8321_v28 = vld [vmem:[%s7652_s13 + $0x120] ss:$8 sps:$4 sm:$0xff]  }
 0x180   : > { %4287 = vmatmul.mubr.bf16.vlgmr.msra.gmra.mrb[0].mxu0 %v7952_v42  ;;  %5462 = vmatprep.mubr.msk.bf16.mxu1 %vm601_vm0, %v7009_v30  ;;  %v7017_v42 = vld [vmem:[%s7370_s7 + $0x114] ss:$8 sps:$4 sm:$0xff]   ;;  %v7069_v30 = vld [vmem:[%s7380_s12 + $0x84] ss:$8 sps:$4 sm:$0xff]  }
 0x181   : > { %4770 = vmatpush1.bf16.msra.mxu0 %v7008_v35  ;;  %6002 = vmatprep.mubr.msk.bf16.mxu0 %vm601_vm0, %v7955_v43  ;;  %v7031_v43 = vld [vmem:[%s8625_s3 + $0x320] sm:$0xff]   ;;  %v8325_v35 = vld [vmem:[%s7652_s13 + $0x134] ss:$8 sps:$4 sm:$0xff]  }
 0x182   : > { %4771 = vmatprep.subr.bf16.mxu0 %v7222_v1 }
 0x185   : > { %4772 = vmatpush1.bf16.msra.mxu0 %v7013_v32  ;;  %v7139_v32 = vld [vmem:[%s8625_s3 + $0x1c8] sm:$0xff]  }
 0x186   : > { %4773 = vmatprep.subr.bf16.mxu0 %v7222_v1 }
 0x187   : > { %1785 = vmatmul.mubr.bf16.gmra.mrb[36].mxu1 %v7011_v33  ;;  %v7140_v33 = vld [vmem:[%s8625_s3 + $0x1d0] sm:$0xff]  }
 0x188   : > { %4295 = vmatmul.mubr.bf16.gmra.mrb[4].mxu0 %v7972_v47  ;;  %5463 = vmatprep.mubr.msk.bf16.mxu1 %vm601_vm0, %v7014_v36  ;;  %v7022_v47 = vld [vmem:[%s7370_s7 + $0x124] ss:$8 sps:$4 sm:$0xff]   ;;  %v7073_v36 = vld [vmem:[%s7380_s12 + $0x80] ss:$8 sps:$4 sm:$0xff]  }
 0x189   : > { %6003 = vmatprep.mubr.msk.bf16.mxu0 %vm601_vm0, %v7978_v50  ;;  %4774 = vmatpush1.bf16.msra.mxu0 %v7021_v40  ;;  %v7040_v50 = vld [vmem:[%s8625_s3 + $0x330] sm:$0xff]  }
 0x18a   : > { %4775 = vmatprep.subr.bf16.mxu0 %v7222_v1  ;;  %v8341_v40 = vld [vmem:[%s7652_s13 + $0x130] ss:$8 sps:$4 sm:$0xff]  }
 0x18d   : > { %4776 = vmatpush1.bf16.msra.mxu0 %v7026_v37  ;;  %v7075_v37 = vld [vmem:[%s7380_s12 + $0x94] ss:$8 sps:$4 sm:$0xff]  }
 0x18e   : > { %4777 = vmatprep.subr.bf16.mxu0 %v7222_v1 }
 0x18f   : > { %1793 = vmatmul.mubr.bf16.gmra.mrb[40].mxu1 %v7016_v39  ;;  %v8345_v39 = vld [vmem:[%s7652_s13 + $0x144] ss:$8 sps:$4 sm:$0xff]  }
 0x190   : > { %4303 = vmatmul.mubr.bf16.gmra.mrb[8].mxu0 %v7991_v52  ;;  %5464 = vmatprep.mubr.msk.bf16.mxu1 %vm601_vm0, %v7017_v42  ;;  %v7044_v52 = vld [vmem:[%s8625_s3 + $0x338] sm:$0xff]  }
 0x191   : > { %6004 = vmatprep.mubr.msk.bf16.mxu0 %vm601_vm0, %v7995_v55  ;;  %4778 = vmatpush1.bf16.msra.mxu0 %v7031_v43  ;;  %v7027_v55 = vld [vmem:[%s7370_s7 + $0x134] ss:$8 sps:$4 sm:$0xff]   ;;  %v7080_v43 = vld [vmem:[%s7652_s13 + $0x140] ss:$8 sps:$4 sm:$0xff]  }
 0x192   : > { %4779 = vmatprep.subr.bf16.mxu0 %v7222_v1  ;;  %v7141_v42 = vld [vmem:[%s8625_s3 + $0x1d8] sm:$0xff]  }
 0x195   : > { %4780 = vmatpush1.bf16.msra.mxu0 %v7036_v44  ;;  %v7082_v44 = vld [vmem:[%s7380_s12 + $0xa4] ss:$8 sps:$4 sm:$0xff]  }
 0x196   : > { %4781 = vmatprep.subr.bf16.mxu0 %v7222_v1 }
 0x197   : > { %1801 = vmatmul.mubr.bf16.gmra.mrb[44].mxu1 %v7020_v46  ;;  %v7084_v46 = vld [vmem:[%s7380_s12 + $0xa0] ss:$8 sps:$4 sm:$0xff]  }
 0x198   : > { %4311 = vmatmul.mubr.bf16.gmra.mrb[12].mxu0 %v8004_v58  ;;  %5465 = vmatprep.mubr.msk.bf16.mxu1 %vm601_vm0, %v7022_v47  ;;  %v7061_v58 = vld [vmem:[%s8625_s3 + $0x348] sm:$0xff]   ;;  %v7085_v47 = vld [vmem:[%s7380_s12 + $0xb4] ss:$8 sps:$4 sm:$0xff]  }
 0x199   : > { %6005 = vmatprep.mubr.msk.bf16.mxu0 %vm601_vm0, %v8011_v62  ;;  %4782 = vmatpush1.bf16.msra.mxu0 %v7040_v50  ;;  %v7081_v62 = vld [vmem:[%s8625_s3 + $0x358] sm:$0xff]  }
 0x19a   : > { %4783 = vmatprep.subr.bf16.mxu0 %v7222_v1  ;;  %v7087_v50 = vld [vmem:[%s7380_s12 + $0xb0] ss:$8 sps:$4 sm:$0xff]  }
 0x19d   : > { %4784 = vmatpush1.bf16.msra.mxu0 %v7044_v52  ;;  %v7088_v52 = vld [vmem:[%s7380_s12 + $0xc4] ss:$8 sps:$4 sm:$0xff]  }
 0x19e   : > { %4785 = vmatprep.subr.bf16.mxu0 %v7222_v1 }
 0x19f   : > { %1809 = vmatmul.mubr.bf16.gmra.mrb[48].mxu1 %v7024_v54  ;;  %v7100_v54 = vld [vmem:[%s7380_s12 + $0x104] ss:$8 sps:$4 sm:$0xff]  }
 0x1a0   : > { %4319 = vmatmul.mubr.bf16.gmra.mrb[16].mxu0 %v8023_v3  ;;  %5466 = vmatprep.mubr.msk.bf16.mxu1 %vm601_vm0, %v7027_v55  ;;  %v7041_v3 = vld [vmem:[%s7380_s12 + $0x34] ss:$8 sps:$4 sm:$0xff]   ;;  %v7109_v55 = vld [vmem:[%s7652_s13 + $0x164] ss:$8 sps:$4 sm:$0xff]  }
 0x1a1   : > { %6006 = vmatprep.mubr.msk.bf16.mxu0 %vm601_vm0, %v8027_v4  ;;  %4786 = vmatpush1.bf16.msra.mxu0 %v7054_v56  ;;  %v7111_v56 = vld [vmem:[%s7652_s13 + $0x160] ss:$8 sps:$4 sm:$0xff]  }
 0x1a2   : > { %4787 = vmatprep.subr.bf16.mxu0 %v7222_v1 }
 0x1a5   : > { %4788 = vmatpush1.bf16.msra.mxu0 %v7061_v58  ;;  %v7112_v58 = vld [vmem:[%s7380_s12 + $0x124] ss:$8 sps:$4 sm:$0xff]  }
 0x1a6   : > { %4789 = vmatprep.subr.bf16.mxu0 %v7222_v1 }
 0x1a7   : > { %1817 = vmatmul.mubr.bf16.gmra.mrb[52].mxu1 %v7029_v59  ;;  %v7114_v59 = vld [vmem:[%s7652_s13 + $0x174] ss:$8 sps:$4 sm:$0xff]  }
 0x1a8   : > { %4327 = vmatmul.mubr.bf16.gmra.mrb[20].mxu0 %v8043_v7  ;;  %5467 = vmatprep.mubr.msk.bf16.mxu1 %vm601_vm0, %v7975_v48  ;;  %v7035_v48 = vld [vmem:[%s7370_s7 + $0x150] ss:$8 sps:$4 sm:$0xff]  }
 0x1a9   : > { %6007 = vmatprep.mubr.msk.bf16.mxu0 %vm601_vm0, %v8047_v45  ;;  %4790 = vmatpush1.bf16.msra.mxu0 %v7068_v60  ;;  %v7116_v60 = vld [vmem:[%s7380_s12 + $0x120] ss:$8 sps:$4 sm:$0xff]  }
 0x1aa   : > { %4791 = vmatprep.subr.bf16.mxu0 %v7222_v1 }
 0x1ad   : > { %4792 = vmatpush1.bf16.msra.mxu0 %v7081_v62  ;;  %v7117_v62 = vld [vmem:[%s7652_s13 + $0x170] ss:$8 sps:$4 sm:$0xff]  }
 0x1af   : > { %1825 = vmatmul.mubr.bf16.gmra.mrb[56].mxu1 %v7988_v51  ;;  %v7037_v51 = vld [vmem:[%s7380_s12 + $0x20] ss:$8 sps:$4 sm:$0xff]  }
 0x1b0   : > { %4335 = vmatmul.mubr.bf16.gmra.mrb[24].mxu0 %v8063_v53  ;;  %5468 = vmatprep.mubr.msk.bf16.mxu1 %vm601_vm0, %v7032_v63  ;;  %v7118_v63 = vld [vmem:[%s7380_s12 + $0x134] ss:$8 sps:$4 sm:$0xff]  }
 0x1b1   : > { %6008 = vmatprep.mubr.msk.bf16.mxu0 %vm601_vm0, %v8067_v11 }
 0x1b7   : > { %1833 = vmatmul.mubr.bf16.gmra.mrb[60].mxu1 %v7035_v48  ;;  %v7120_v48 = vld [vmem:[%s7652_s13 + $0x184] ss:$8 sps:$4 sm:$0xff]  }
 0x1b8   : > { %4343 = vmatmul.mubr.bf16.gmra.mrb[28].mxu0 %v8083_v15  ;;  %5569 = vmatprep.mubr.msk.bf16.mxu1 %vm601_vm0, %v7039_v0  ;;  %v7122_v0 = vld [vmem:[%s7380_s12 + $0x130] ss:$8 sps:$4 sm:$0xff]  }
 0x1b9   : > { %6009 = vmatprep.mubr.msk.bf16.mxu0 %vm601_vm0, %v8087_v6 }
 0x1bf   : > { %2228 = vmatmul.mubr.bf16.vlgmr.msra.gmra.mrb[0].mxu1 %v7037_v51  ;;  %v7123_v51 = vld [vmem:[%s7652_s13 + $0x180] ss:$8 sps:$4 sm:$0xff]  }
 0x1c0   : > { %4351 = vmatmul.mubr.bf16.gmra.mrb[32].mxu0 %v8103_v14  ;;  %6151 = vmatpush1.bf16.msra.mxu1 %v7130_v31  ;;  %v7126_v31 = vld [vmem:[%s7652_s13 + $0x194] ss:$8 sps:$4 sm:$0xff]  }
 0x1c1   : > { %5570 = vmatprep.mubr.msk.bf16.mxu1 %vm601_vm0, %v7041_v3  ;;  %6010 = vmatprep.mubr.msk.bf16.mxu0 %vm601_vm0, %v8107_v16  ;;  %v7124_v3 = vld [vmem:[%s7380_s12 + $0x144] ss:$8 sps:$4 sm:$0xff]  }
 0x1c2   : > { %6140 = vmatprep.subr.bf16.mxu1 %v7222_v1 }
 0x1c4   : > { %6152 = vmatpush1.bf16.msra.mxu1 %v7131_v38  ;;  %v7129_v38 = vld [vmem:[%s7652_s13 + $0x190] ss:$8 sps:$4 sm:$0xff]  }
 0x1c5   : > { %6141 = vmatprep.subr.bf16.mxu1 %v7222_v1 }
 0x1c7   : > { %2236 = vmatmul.mubr.bf16.gmra.mrb[4].mxu1 %v7043_v34  ;;  %v7128_v34 = vld [vmem:[%s7380_s12 + $0x140] ss:$8 sps:$4 sm:$0xff]  }
 0x1c8   : > { %4359 = vmatmul.mubr.bf16.gmra.mrb[36].mxu0 %v8123_v25  ;;  %5571 = vmatprep.mubr.msk.bf16.mxu1 %vm601_vm0, %v7045_v5 }
 0x1c9   : > { %6011 = vmatprep.mubr.msk.bf16.mxu0 %vm601_vm0, %v8127_v24  ;;  %6153 = vmatpush1.bf16.msra.mxu1 %v7132_v41 }
 0x1ca   : > { %6142 = vmatprep.subr.bf16.mxu1 %v7222_v1 }
 0x1cd   : > { %6154 = vmatpush1.bf16.msra.mxu1 %v7133_v10 }
 0x1ce   : > { %6143 = vmatprep.subr.bf16.mxu1 %v7222_v1 }
 0x1cf   : > { %2244 = vmatmul.mubr.bf16.gmra.mrb[8].mxu1 %v7047_v8 }
 0x1d0   : > { %4367 = vmatmul.mubr.bf16.gmra.mrb[40].mxu0 %v8136_v29  ;;  %5572 = vmatprep.mubr.msk.bf16.mxu1 %vm601_vm0, %v7048_v9 }
 0x1d1   : > { %6012 = vmatprep.mubr.msk.bf16.mxu0 %vm601_vm0, %v8265_v49  ;;  %6155 = vmatpush1.bf16.msra.mxu1 %v7134_v57 }
 0x1d2   : > { %6144 = vmatprep.subr.bf16.mxu1 %v7222_v1 }
 0x1d5   : > { %6156 = vmatpush1.bf16.msra.mxu1 %v7135_v21 }
 0x1d6   : > { %6145 = vmatprep.subr.bf16.mxu1 %v7222_v1 }
 0x1d7   : > { %2252 = vmatmul.mubr.bf16.gmra.mrb[12].mxu1 %v7052_v61 }
 0x1d8   : > { %4375 = vmatmul.mubr.bf16.gmra.mrb[44].mxu0 %v8281_v13  ;;  %5573 = vmatprep.mubr.msk.bf16.mxu1 %vm601_vm0, %v7055_v2 }
 0x1d9   : > { %6013 = vmatprep.mubr.msk.bf16.mxu0 %vm601_vm0, %v8285_v17  ;;  %6157 = vmatpush1.bf16.msra.mxu1 %v7136_v12 }
 0x1da   : > { %6146 = vmatprep.subr.bf16.mxu1 %v7222_v1 }
 0x1dd   : > { %6158 = vmatpush1.bf16.msra.mxu1 %v7137_v22 }
 0x1de   : > { %6147 = vmatprep.subr.bf16.mxu1 %v7222_v1 }
 0x1df   : > { %2260 = vmatmul.mubr.bf16.gmra.mrb[16].mxu1 %v7059_v23 }
 0x1e0   : > { %4383 = vmatmul.mubr.bf16.gmra.mrb[48].mxu0 %v8301_v18  ;;  %5574 = vmatprep.mubr.msk.bf16.mxu1 %vm601_vm0, %v7062_v19 }
 0x1e1   : > { %6014 = vmatprep.mubr.msk.bf16.mxu0 %vm601_vm0, %v8305_v20  ;;  %6159 = vmatpush1.bf16.msra.mxu1 %v7138_v26 }
 0x1e2   : > { %6148 = vmatprep.subr.bf16.mxu1 %v7222_v1 }
 0x1e5   : > { %6160 = vmatpush1.bf16.msra.mxu1 %v7139_v32 }
 0x1e6   : > { %6149 = vmatprep.subr.bf16.mxu1 %v7222_v1 }
 0x1e7   : > { %2268 = vmatmul.mubr.bf16.gmra.mrb[20].mxu1 %v7066_v27 }
 0x1e8   : > { %4391 = vmatmul.mubr.bf16.gmra.mrb[52].mxu0 %v8321_v28  ;;  %5575 = vmatprep.mubr.msk.bf16.mxu1 %vm601_vm0, %v7069_v30 }
 0x1e9   : > { %6015 = vmatprep.mubr.msk.bf16.mxu0 %vm601_vm0, %v8325_v35  ;;  %6161 = vmatpush1.bf16.msra.mxu1 %v7140_v33 }
 0x1ea   : > { %6150 = vmatprep.subr.bf16.mxu1 %v7222_v1  ;;  %v7079_v1 = vld [vmem:[%s7380_s12 + $0x90] ss:$8 sps:$4 sm:$0xff]  }
 0x1ed   : > { %6162 = vmatpush1.bf16.msra.mxu1 %v7141_v42 }
 0x1ef   : > { %2276 = vmatmul.mubr.bf16.gmra.mrb[24].mxu1 %v7073_v36 }
 0x1f0   : > { %4399 = vmatmul.mubr.bf16.gmra.mrb[56].mxu0 %v8341_v40  ;;  %5576 = vmatprep.mubr.msk.bf16.mxu1 %vm601_vm0, %v7075_v37 }
 0x1f1   : > { %6016 = vmatprep.mubr.msk.bf16.mxu0 %vm601_vm0, %v8345_v39 }
 0x1f7   : > { %2284 = vmatmul.mubr.bf16.gmra.mrb[28].mxu1 %v7079_v1 }
 0x1f8   : > { %4407 = vmatmul.mubr.bf16.gmra.mrb[60].mxu0 %v7080_v43  ;;  %5577 = vmatprep.mubr.msk.bf16.mxu1 %vm601_vm0, %v7082_v44  ;;  %v8457_v44 = vld [vmem:[%s8626_s4] ss:$0 sm:$0xff] }
 0x1f9   : > { %6117 = vmatprep.mubr.msk.bf16.mxu0 %vm601_vm0, %v8027_v4  ;;  %v7090_v4 = vld [vmem:[%s7380_s12 + $0xc0] ss:$8 sps:$4 sm:$0xff]  }
 0x1ff   : > { %2292 = vmatmul.mubr.bf16.gmra.mrb[32].mxu1 %v7084_v46 }
 0x200   : > { %4802 = vmatmul.mubr.bf16.vlgmr.msra.gmra.mrb[0].mxu0 %v8043_v7  ;;  %5578 = vmatprep.mubr.msk.bf16.mxu1 %vm601_vm0, %v7085_v47  ;;  %v7091_v7 = vld [vmem:[%s7380_s12 + $0xd4] ss:$8 sps:$4 sm:$0xff]  }
 0x201   : > { %6118 = vmatprep.mubr.msk.bf16.mxu0 %vm601_vm0, %v8047_v45  ;;  %v7093_v45 = vld [vmem:[%s7380_s12 + $0xd0] ss:$8 sps:$4 sm:$0xff]  }
 0x207   : > { %2300 = vmatmul.mubr.bf16.gmra.mrb[36].mxu1 %v7087_v50 }
 0x208   : > { %4810 = vmatmul.mubr.bf16.gmra.mrb[4].mxu0 %v8063_v53  ;;  %5579 = vmatprep.mubr.msk.bf16.mxu1 %vm601_vm0, %v7088_v52  ;;  %v7094_v53 = vld [vmem:[%s7380_s12 + $0xe4] ss:$8 sps:$4 sm:$0xff]  }
 0x209   : > { %6119 = vmatprep.mubr.msk.bf16.mxu0 %vm601_vm0, %v8067_v11  ;;  %v7096_v11 = vld [vmem:[%s7380_s12 + $0xe0] ss:$8 sps:$4 sm:$0xff]  }
 0x20f   : > { %2308 = vmatmul.mubr.bf16.gmra.mrb[40].mxu1 %v7090_v4 }
 0x210   : > { %4818 = vmatmul.mubr.bf16.gmra.mrb[8].mxu0 %v8083_v15  ;;  %5580 = vmatprep.mubr.msk.bf16.mxu1 %vm601_vm0, %v7091_v7  ;;  %v7097_v15 = vld [vmem:[%s7380_s12 + $0xf4] ss:$8 sps:$4 sm:$0xff]  }
 0x211   : > { %6120 = vmatprep.mubr.msk.bf16.mxu0 %vm601_vm0, %v8087_v6  ;;  %v7099_v6 = vld [vmem:[%s7380_s12 + $0xf0] ss:$8 sps:$4 sm:$0xff]  }
 0x217   : > { %2316 = vmatmul.mubr.bf16.gmra.mrb[44].mxu1 %v7093_v45 }
 0x218   : > { %4826 = vmatmul.mubr.bf16.gmra.mrb[12].mxu0 %v8103_v14  ;;  %5581 = vmatprep.mubr.msk.bf16.mxu1 %vm601_vm0, %v7094_v53  ;;  %v7102_v14 = vld [vmem:[%s7380_s12 + $0x100] ss:$8 sps:$4 sm:$0xff]  }
 0x219   : > { %6121 = vmatprep.mubr.msk.bf16.mxu0 %vm601_vm0, %v8107_v16  ;;  %v7103_v16 = vld [vmem:[%s7380_s12 + $0x114] ss:$8 sps:$4 sm:$0xff]  }
 0x21f   : > { %2324 = vmatmul.mubr.bf16.gmra.mrb[48].mxu1 %v7096_v11 }
 0x220   : > { %4834 = vmatmul.mubr.bf16.gmra.mrb[16].mxu0 %v8123_v25  ;;  %5582 = vmatprep.mubr.msk.bf16.mxu1 %vm601_vm0, %v7097_v15  ;;  %v7105_v25 = vld [vmem:[%s7380_s12 + $0x110] ss:$8 sps:$4 sm:$0xff]   ;;  %s289_s12 = sand.u32 1, %s7204_s19  }
 0x221   : > { %6122 = vmatprep.mubr.msk.bf16.mxu0 %vm601_vm0, %v8127_v24  ;;  %v7106_v24 = vld [vmem:[%s7652_s13 + $0x154] ss:$8 sps:$4 sm:$0xff]   ;;  %s5140_s9 = sshll.u32 %s289_s12, 8  ;;  %s8576_s21 = scalar_lea.sflag [#allocation3], %s289_s12 }
 0x222   : > { %s8463_s10 = scalar_lea.vmem [#allocation2], %s5140_s9 }
 0x223   : > { %s5011_s7 = sshll.u32 %s8463_s10, 4  ;;  %s8568_s7 = int_to_ptr.vmem [resolvable:$true] %s5011_s7 }
 0x224   : > { %s7142_s17 = scalar_lea.vmem %s8568_s7, 4096  ;;  %p7149_p1 = scmp.lt.s32.totalorder %s8568_s7, %s7147_s25 }
 0x225   : > { %p7143_p12 = scmp.ne.s32.totalorder %s8568_s7, %s7142_s17  ;;  %p7150_p2 = scmp.lt.s32.totalorder %s7148_s27, %s7142_s17 }
 0x227   : > { %2332 = vmatmul.mubr.bf16.gmra.mrb[52].mxu1 %v7099_v6  ;;  %p7144_p13 = pnand %p7143_p12, %p7296_p4  ;;  %p7151_p3 = por %p7150_p2, %p7149_p1 }
 0x228   : > { %4842 = vmatmul.mubr.bf16.gmra.mrb[20].mxu0 %v8136_v29  ;;  %5583 = vmatprep.mubr.msk.bf16.mxu1 %vm601_vm0, %v7100_v54  ;;  %v7108_v29 = vld [vmem:[%s7652_s13 + $0x150] ss:$8 sps:$4 sm:$0xff]  }
 0x229   : > { %6123 = vmatprep.mubr.msk.bf16.mxu0 %vm601_vm0, %v8265_v49  ;;  %p7145_p0 = pneg %p7144_p13 }
 0x22b   : > { %p7152_p5 = pnand %p7151_p3, %p7145_p0 }
 0x22f   : > { %2340 = vmatmul.mubr.bf16.gmra.mrb[56].mxu1 %v7102_v14 }
 0x230   : > { %4850 = vmatmul.mubr.bf16.gmra.mrb[24].mxu0 %v8281_v13  ;;  %5584 = vmatprep.mubr.msk.bf16.mxu1 %vm601_vm0, %v7103_v16 }
 0x231   : > { %6124 = vmatprep.mubr.msk.bf16.mxu0 %vm601_vm0, %v8285_v17 }
 0x237   : > { %2348 = vmatmul.mubr.bf16.gmra.mrb[60].mxu1 %v7105_v25 }
 0x238   : > { %4858 = vmatmul.mubr.bf16.gmra.mrb[28].mxu0 %v8301_v18  ;;  %5693 = vmatprep.mubr.msk.bf16.mxu1 %vm601_vm0, %v7091_v7 }
 0x239   : > { %6125 = vmatprep.mubr.msk.bf16.mxu0 %vm601_vm0, %v8305_v20 }
 0x23f   : > { %2807 = vmatmul.mubr.bf16.vlgmr.msra.gmra.mrb[32].mxu1 %v7093_v45 }
 0x240   : > { %4866 = vmatmul.mubr.bf16.gmra.mrb[32].mxu0 %v8321_v28  ;;  %5694 = vmatprep.mubr.msk.bf16.mxu1 %vm601_vm0, %v7094_v53 }
 0x241   : > { %6126 = vmatprep.mubr.msk.bf16.mxu0 %vm601_vm0, %v8325_v35 }
 0x247   : > { %2815 = vmatmul.mubr.bf16.gmra.mrb[36].mxu1 %v7096_v11 }
 0x248   : > { %4874 = vmatmul.mubr.bf16.gmra.mrb[36].mxu0 %v8341_v40  ;;  %5695 = vmatprep.mubr.msk.bf16.mxu1 %vm601_vm0, %v7097_v15 }
 0x249   : > { %6127 = vmatprep.mubr.msk.bf16.mxu0 %vm601_vm0, %v8345_v39 }
 0x24f   : > { %2823 = vmatmul.mubr.bf16.gmra.mrb[40].mxu1 %v7099_v6 }
 0x250   : > { %4882 = vmatmul.mubr.bf16.gmra.mrb[40].mxu0 %v7080_v43  ;;  %5696 = vmatprep.mubr.msk.bf16.mxu1 %vm601_vm0, %v7100_v54 }
 0x251   : > { %6128 = vmatprep.mubr.msk.bf16.mxu0 %vm601_vm0, %v7106_v24 }
 0x257   : > { %2831 = vmatmul.mubr.bf16.gmra.mrb[44].mxu1 %v7102_v14 }
 0x258   : > { %4890 = vmatmul.mubr.bf16.gmra.mrb[44].mxu0 %v7108_v29  ;;  %5697 = vmatprep.mubr.msk.bf16.mxu1 %vm601_vm0, %v7103_v16 }
 0x259   : > { %6129 = vmatprep.mubr.msk.bf16.mxu0 %vm601_vm0, %v7109_v55 }
 0x25f   : > { %2839 = vmatmul.mubr.bf16.gmra.mrb[48].mxu1 %v7105_v25 }
 0x260   : > { %4898 = vmatmul.mubr.bf16.gmra.mrb[48].mxu0 %v7111_v56  ;;  %5698 = vmatprep.mubr.msk.bf16.mxu1 %vm601_vm0, %v7112_v58 }
 0x261   : > { %6130 = vmatprep.mubr.msk.bf16.mxu0 %vm601_vm0, %v7114_v59 }
 0x267   : > { %2847 = vmatmul.mubr.bf16.gmra.mrb[52].mxu1 %v7116_v60 }
 0x268   : > { %4906 = vmatmul.mubr.bf16.gmra.mrb[52].mxu0 %v7117_v62  ;;  %5699 = vmatprep.mubr.msk.bf16.mxu1 %vm601_vm0, %v7118_v63 }
 0x269   : > { %6131 = vmatprep.mubr.msk.bf16.mxu0 %vm601_vm0, %v7120_v48 }
 0x26f   : > { %2855 = vmatmul.mubr.bf16.gmra.mrb[56].mxu1 %v7122_v0 }
 0x270   : > { %4914 = vmatmul.mubr.bf16.gmra.mrb[56].mxu0 %v7123_v51  ;;  %5700 = vmatprep.mubr.msk.bf16.mxu1 %vm601_vm0, %v7124_v3 }
 0x271   : > { %6132 = vmatprep.mubr.msk.bf16.mxu0 %vm601_vm0, %v7126_v31 }
 0x277   : > { %2863 = vmatmul.mubr.bf16.gmra.mrb[60].mxu1 %v7128_v34 }
 0x278   : > { %4922 = vmatmul.mubr.bf16.gmra.mrb[60].mxu0 %v7129_v38 }
 0x292   : > { %v2229_v5 = vpop.f32.mrb[0].mxu1 }
 0x293   : > { %v2231_v41 = vpop.f32.mrb[1].mxu1  ;;  %v6163_v46 = vadd.f32 %v8457_v44, %v2229_v5 }
 0x294   : > { %v2232_v8 = vpop.f32.mrb[2].mxu1 }
 0x295   : > { %v2234_v9 = vpop.f32.mrb[3].mxu1  ;;  %v6165_v50 = vadd.f32 %v8457_v44, %v2232_v8 }
 0x29a   : > { %v2237_v49 = vpop.f32.mrb[4].mxu1 }
 0x29b   : > { %v2239_v10 = vpop.f32.mrb[5].mxu1  ;;  %v6167_v11 = vadd.f32 %v8457_v44, %v2237_v49 }
 0x29c   : > { %v2240_v57 = vpop.f32.mrb[6].mxu1 }
 0x29d   : > { %v2242_v61 = vpop.f32.mrb[7].mxu1  ;;  %v6169_v6 = vadd.f32 %v8457_v44, %v2240_v57 }
 0x2a2   : > { %v2245_v13 = vpop.f32.mrb[8].mxu1 }
 0x2a3   : > { %v2247_v2 = vpop.f32.mrb[9].mxu1  ;;  %v6171_v29 = vadd.f32 %v8457_v44, %v2245_v13 }
 0x2a4   : > { %v2248_v17 = vpop.f32.mrb[10].mxu1 }
 0x2a5   : > { %v2250_v21 = vpop.f32.mrb[11].mxu1  ;;  %v6173_v56 = vadd.f32 %v8457_v44, %v2248_v17 }
 0x2aa   : > { %v2253_v12 = vpop.f32.mrb[12].mxu1 }
 0x2ab   : > { %v2255_v23 = vpop.f32.mrb[13].mxu1  ;;  %v6175_v48 = vadd.f32 %v8457_v44, %v2253_v12 }
 0x2ac   : > { %v2256_v18 = vpop.f32.mrb[14].mxu1 }
 0x2ad   : > { %v2258_v19 = vpop.f32.mrb[15].mxu1  ;;  %v6177_v51 = vadd.f32 %v8457_v44, %v2256_v18 }
 0x2b2   : > { %v2261_v20 = vpop.f32.mrb[16].mxu1 }
 0x2b3   : > { %v2263_v22 = vpop.f32.mrb[17].mxu1  ;;  %v6179_v41 = vadd.f32 %v8457_v44, %v2261_v20 }
 0x2b4   : > { %v2264_v26 = vpop.f32.mrb[18].mxu1 }
 0x2b5   : > { %v2266_v27 = vpop.f32.mrb[19].mxu1  ;;  %v6181_v9 = vadd.f32 %v8457_v44, %v2264_v26 }
 0x2ba   : > { %v8441_v28 = vpop.f32.mrb[20].mxu1 }
 0x2bb   : > { %v2271_v30 = vpop.f32.mrb[21].mxu1  ;;  %v6183_v2 = vadd.f32 %v8457_v44, %v8441_v28 }
 0x2bc   : > { %v8443_v35 = vpop.f32.mrb[22].mxu1 }
 0x2bd   : > { %v2274_v32 = vpop.f32.mrb[23].mxu1  ;;  %v6185_v21 = vadd.f32 %v8457_v44, %v8443_v35 }
 0x2c2   : > { %v8445_v33 = vpop.f32.mrb[24].mxu1 }
 0x2c3   : > { %v2279_v36 = vpop.f32.mrb[25].mxu1  ;;  %v6187_v22 = vadd.f32 %v8457_v44, %v8445_v33 }
 0x2c4   : > { %v8447_v40 = vpop.f32.mrb[26].mxu1 }
 0x2c5   : > { %v2282_v37 = vpop.f32.mrb[27].mxu1  ;;  %v6189_v27 = vadd.f32 %v8457_v44, %v8447_v40 }
 0x2ca   : > { %v8449_v39 = vpop.f32.mrb[28].mxu1 }
 0x2cb   : > { %v2287_v42 = vpop.f32.mrb[29].mxu1  ;;  %v6191_v37 = vadd.f32 %v8457_v44, %v8449_v39 }
 0x2cc   : > { %v8451_v1 = vpop.f32.mrb[30].mxu1 }
 0x2cd   : > { %v2290_v43 = vpop.f32.mrb[31].mxu1  ;;  %v6193_v33 = vadd.f32 %v8457_v44, %v8451_v1 }
 0x2d3   : > { %v4803_v47 = vpop.f32.mrb[0].mxu0 }
 0x2d4   : > { %v6164_v52 = vadd.f32 %v6163_v46, %v4803_v47  ;;  %v4805_v4 = vpop.f32.mrb[1].mxu0 }
 0x2d5   : > { %v4806_v7 = vpop.f32.mrb[2].mxu0 }
 0x2d6   : > { %4962 = vst.msk [vmem:[%s8463_s10] sm:$0xff] %vm601_vm0, %v6164_v52  ;;  %v6166_v45 = vadd.f32 %v6165_v50, %v4806_v7  ;;  %v4808_v53 = vpop.f32.mrb[3].mxu0 }
 0x2d8   : > { %4963 = vst.msk [vmem:[%s8463_s10 + $0x8] sm:$0xff] %vm601_vm0, %v6166_v45 }
 0x2db   : > { %v4811_v15 = vpop.f32.mrb[4].mxu0 }
 0x2dc   : > { %v6168_v54 = vadd.f32 %v6167_v11, %v4811_v15  ;;  %v4813_v14 = vpop.f32.mrb[5].mxu0 }
 0x2dd   : > { %v4814_v16 = vpop.f32.mrb[6].mxu0 }
 0x2de   : > { %4964 = vst.msk [vmem:[%s8463_s10 + $0x10] sm:$0xff] %vm601_vm0, %v6168_v54  ;;  %v6170_v25 = vadd.f32 %v6169_v6, %v4814_v16  ;;  %v4816_v24 = vpop.f32.mrb[7].mxu0 }
 0x2e0   : > { %4965 = vst.msk [vmem:[%s8463_s10 + $0x18] sm:$0xff] %vm601_vm0, %v6170_v25 }
 0x2e3   : > { %v4819_v55 = vpop.f32.mrb[8].mxu0 }
 0x2e4   : > { %v6172_v58 = vadd.f32 %v6171_v29, %v4819_v55  ;;  %v4821_v59 = vpop.f32.mrb[9].mxu0 }
 0x2e5   : > { %v4822_v60 = vpop.f32.mrb[10].mxu0 }
 0x2e6   : > { %4966 = vst.msk [vmem:[%s8463_s10 + $0x20] sm:$0xff] %vm601_vm0, %v6172_v58  ;;  %v6174_v62 = vadd.f32 %v6173_v56, %v4822_v60  ;;  %v4824_v63 = vpop.f32.mrb[11].mxu0 }
 0x2e8   : > { %4967 = vst.msk [vmem:[%s8463_s10 + $0x28] sm:$0xff] %vm601_vm0, %v6174_v62 }
 0x2eb   : > { %v4827_v0 = vpop.f32.mrb[12].mxu0 }
 0x2ec   : > { %v6176_v3 = vadd.f32 %v6175_v48, %v4827_v0  ;;  %v4829_v31 = vpop.f32.mrb[13].mxu0 }
 0x2ed   : > { %v4830_v34 = vpop.f32.mrb[14].mxu0 }
 0x2ee   : > { %4968 = vst.msk [vmem:[%s8463_s10 + $0x30] sm:$0xff] %vm601_vm0, %v6176_v3  ;;  %v6178_v38 = vadd.f32 %v6177_v51, %v4830_v34  ;;  %v4832_v5 = vpop.f32.mrb[15].mxu0 }
 0x2f0   : > { %4969 = vst.msk [vmem:[%s8463_s10 + $0x38] sm:$0xff] %vm601_vm0, %v6178_v38 }
 0x2f3   : > { %v4835_v8 = vpop.f32.mrb[16].mxu0 }
 0x2f4   : > { %v6180_v49 = vadd.f32 %v6179_v41, %v4835_v8  ;;  %v4837_v10 = vpop.f32.mrb[17].mxu0 }
 0x2f5   : > { %v4838_v57 = vpop.f32.mrb[18].mxu0 }
 0x2f6   : > { %4970 = vst.msk [vmem:[%s8463_s10 + $0x40] sm:$0xff] %vm601_vm0, %v6180_v49  ;;  %v6182_v61 = vadd.f32 %v6181_v9, %v4838_v57  ;;  %v4840_v13 = vpop.f32.mrb[19].mxu0 }
 0x2f8   : > { %4971 = vst.msk [vmem:[%s8463_s10 + $0x48] sm:$0xff] %vm601_vm0, %v6182_v61 }
 0x2fb   : > { %v4843_v17 = vpop.f32.mrb[20].mxu0 }
 0x2fc   : > { %v6184_v12 = vadd.f32 %v6183_v2, %v4843_v17  ;;  %v4845_v23 = vpop.f32.mrb[21].mxu0 }
 0x2fd   : > { %v4846_v18 = vpop.f32.mrb[22].mxu0 }
 0x2fe   : > { %4972 = vst.msk [vmem:[%s8463_s10 + $0x50] sm:$0xff] %vm601_vm0, %v6184_v12  ;;  %v6186_v19 = vadd.f32 %v6185_v21, %v4846_v18  ;;  %v4848_v20 = vpop.f32.mrb[23].mxu0 }
 0x300   : > { %4973 = vst.msk [vmem:[%s8463_s10 + $0x58] sm:$0xff] %vm601_vm0, %v6186_v19 }
 0x303   : > { %v4851_v26 = vpop.f32.mrb[24].mxu0 }
 0x304   : > { %v6188_v28 = vadd.f32 %v6187_v22, %v4851_v26  ;;  %v4853_v30 = vpop.f32.mrb[25].mxu0 }
 0x305   : > { %v4854_v35 = vpop.f32.mrb[26].mxu0 }
 0x306   : > { %4974 = vst.msk [vmem:[%s8463_s10 + $0x60] sm:$0xff] %vm601_vm0, %v6188_v28  ;;  %v6190_v32 = vadd.f32 %v6189_v27, %v4854_v35  ;;  %v4856_v36 = vpop.f32.mrb[27].mxu0 }
 0x308   : > { %4975 = vst.msk [vmem:[%s8463_s10 + $0x68] sm:$0xff] %vm601_vm0, %v6190_v32 }
 0x30b   : > { %v4859_v42 = vpop.f32.mrb[28].mxu0 }
 0x30c   : > { %v6192_v43 = vadd.f32 %v6191_v37, %v4859_v42  ;;  %v4861_v46 = vpop.f32.mrb[29].mxu0 }
 0x30d   : > { %v4862_v40 = vpop.f32.mrb[30].mxu0 }
 0x30e   : > { %4976 = vst.msk [vmem:[%s8463_s10 + $0x70] sm:$0xff] %vm601_vm0, %v6192_v43  ;;  %v6194_v47 = vadd.f32 %v6193_v33, %v4862_v40  ;;  %v4864_v50 = vpop.f32.mrb[31].mxu0 }
 0x310   : > { %4977 = vst.msk [vmem:[%s8463_s10 + $0x78] sm:$0xff] %vm601_vm0, %v6194_v47 }
 0x312   : > { %v2808_v52 = vpop.f32.mrb[32].mxu1 }
 0x313   : > { %v6195_v4 = vadd.f32 %v8457_v44, %v2808_v52  ;;  %v4867_v7 = vpop.f32.mrb[32].mxu0  ;;  %v2810_v39 = vpop.f32.mrb[33].mxu1 }
 0x314   : > { %v4869_v45 = vpop.f32.mrb[33].mxu0  ;;  %v2811_v53 = vpop.f32.mrb[34].mxu1 }
 0x315   : > { %v6196_v11 = vadd.f32 %v6195_v4, %v4867_v7  ;;  %v6197_v1 = vadd.f32 %v8457_v44, %v2811_v53  ;;  %v4870_v15 = vpop.f32.mrb[34].mxu0  ;;  %v2813_v6 = vpop.f32.mrb[35].mxu1 }
 0x316   : > { %v4872_v54 = vpop.f32.mrb[35].mxu0 }
 0x317   : > { %4978 = vst.msk [vmem:[%s8463_s10 + $0x80] sm:$0xff] %vm601_vm0, %v6196_v11  ;;  %v6198_v14 = vadd.f32 %v6197_v1, %v4870_v15 }
 0x319   : > { %4979 = vst.msk [vmem:[%s8463_s10 + $0x88] sm:$0xff] %vm601_vm0, %v6198_v14 }
 0x31a   : > { %v2816_v16 = vpop.f32.mrb[36].mxu1 }
 0x31b   : > { %v6199_v25 = vadd.f32 %v8457_v44, %v2816_v16  ;;  %v4875_v24 = vpop.f32.mrb[36].mxu0  ;;  %v2818_v29 = vpop.f32.mrb[37].mxu1 }
 0x31c   : > { %v4877_v55 = vpop.f32.mrb[37].mxu0  ;;  %v2819_v56 = vpop.f32.mrb[38].mxu1 }
 0x31d   : > { %v6200_v58 = vadd.f32 %v6199_v25, %v4875_v24  ;;  %v6201_v59 = vadd.f32 %v8457_v44, %v2819_v56  ;;  %v4878_v60 = vpop.f32.mrb[38].mxu0  ;;  %v2821_v62 = vpop.f32.mrb[39].mxu1 }
 0x31e   : > { %v4880_v63 = vpop.f32.mrb[39].mxu0 }
 0x31f   : > { %4980 = vst.msk [vmem:[%s8463_s10 + $0x90] sm:$0xff] %vm601_vm0, %v6200_v58  ;;  %v6202_v48 = vadd.f32 %v6201_v59, %v4878_v60 }
 0x321   : > { %4981 = vst.msk [vmem:[%s8463_s10 + $0x98] sm:$0xff] %vm601_vm0, %v6202_v48 }
 0x322   : > { %v2824_v0 = vpop.f32.mrb[40].mxu1 }
 0x323   : > { %v6203_v51 = vadd.f32 %v8457_v44, %v2824_v0  ;;  %v4883_v3 = vpop.f32.mrb[40].mxu0  ;;  %v2826_v31 = vpop.f32.mrb[41].mxu1 }
 0x324   : > { %v4885_v34 = vpop.f32.mrb[41].mxu0  ;;  %v2827_v38 = vpop.f32.mrb[42].mxu1 }
 0x325   : > { %v6204_v5 = vadd.f32 %v6203_v51, %v4883_v3  ;;  %v6205_v41 = vadd.f32 %v8457_v44, %v2827_v38  ;;  %v4886_v8 = vpop.f32.mrb[42].mxu0  ;;  %v2829_v9 = vpop.f32.mrb[43].mxu1 }
 0x326   : > { %v4888_v49 = vpop.f32.mrb[43].mxu0 }
 0x327   : > { %4982 = vst.msk [vmem:[%s8463_s10 + $0xa0] sm:$0xff] %vm601_vm0, %v6204_v5  ;;  %v6206_v10 = vadd.f32 %v6205_v41, %v4886_v8 }
 0x329   : > { %4983 = vst.msk [vmem:[%s8463_s10 + $0xa8] sm:$0xff] %vm601_vm0, %v6206_v10 }
 0x32a   : > { %v2832_v57 = vpop.f32.mrb[44].mxu1 }
 0x32b   : > { %v6207_v61 = vadd.f32 %v8457_v44, %v2832_v57  ;;  %v4891_v13 = vpop.f32.mrb[44].mxu0  ;;  %v2834_v2 = vpop.f32.mrb[45].mxu1 }
 0x32c   : > { %v4893_v17 = vpop.f32.mrb[45].mxu0  ;;  %v2835_v21 = vpop.f32.mrb[46].mxu1 }
 0x32d   : > { %v6208_v12 = vadd.f32 %v6207_v61, %v4891_v13  ;;  %v6209_v23 = vadd.f32 %v8457_v44, %v2835_v21  ;;  %v4894_v18 = vpop.f32.mrb[46].mxu0  ;;  %v2837_v19 = vpop.f32.mrb[47].mxu1 }
 0x32e   : > { %v4896_v20 = vpop.f32.mrb[47].mxu0 }
 0x32f   : > { %4984 = vst.msk [vmem:[%s8463_s10 + $0xb0] sm:$0xff] %vm601_vm0, %v6208_v12  ;;  %v6210_v22 = vadd.f32 %v6209_v23, %v4894_v18 }
 0x331   : > { %4985 = vst.msk [vmem:[%s8463_s10 + $0xb8] sm:$0xff] %vm601_vm0, %v6210_v22 }
 0x332   : > { %v2840_v26 = vpop.f32.mrb[48].mxu1 }
 0x333   : > { %v6211_v27 = vadd.f32 %v8457_v44, %v2840_v26  ;;  %v4899_v28 = vpop.f32.mrb[48].mxu0  ;;  %v2842_v30 = vpop.f32.mrb[49].mxu1 }
 0x334   : > { %v4901_v35 = vpop.f32.mrb[49].mxu0  ;;  %v2843_v32 = vpop.f32.mrb[50].mxu1 }
 0x335   : > { %v6212_v36 = vadd.f32 %v6211_v27, %v4899_v28  ;;  %v6213_v37 = vadd.f32 %v8457_v44, %v2843_v32  ;;  %v4902_v42 = vpop.f32.mrb[50].mxu0  ;;  %v2845_v33 = vpop.f32.mrb[51].mxu1 }
 0x336   : > { %v4904_v43 = vpop.f32.mrb[51].mxu0 }
 0x337   : > { %4986 = vst.msk [vmem:[%s8463_s10 + $0xc0] sm:$0xff] %vm601_vm0, %v6212_v36  ;;  %v6214_v46 = vadd.f32 %v6213_v37, %v4902_v42 }
 0x339   : > { %4987 = vst.msk [vmem:[%s8463_s10 + $0xc8] sm:$0xff] %vm601_vm0, %v6214_v46 }
 0x33a   : > { %v2848_v40 = vpop.f32.mrb[52].mxu1 }
 0x33b   : > { %v6215_v47 = vadd.f32 %v8457_v44, %v2848_v40  ;;  %v4907_v50 = vpop.f32.mrb[52].mxu0  ;;  %v2850_v52 = vpop.f32.mrb[53].mxu1 }
 0x33c   : > { %v4909_v4 = vpop.f32.mrb[53].mxu0  ;;  %v2851_v7 = vpop.f32.mrb[54].mxu1 }
 0x33d   : > { %v6216_v39 = vadd.f32 %v6215_v47, %v4907_v50  ;;  %v6217_v45 = vadd.f32 %v8457_v44, %v2851_v7  ;;  %v4910_v53 = vpop.f32.mrb[54].mxu0  ;;  %v2853_v11 = vpop.f32.mrb[55].mxu1 }
 0x33e   : > { %v4912_v1 = vpop.f32.mrb[55].mxu0 }
 0x33f   : > { %4988 = vst.msk [vmem:[%s8463_s10 + $0xd0] sm:$0xff] %vm601_vm0, %v6216_v39  ;;  %v6218_v15 = vadd.f32 %v6217_v45, %v4910_v53 }
 0x341   : > { %4989 = vst.msk [vmem:[%s8463_s10 + $0xd8] sm:$0xff] %vm601_vm0, %v6218_v15 }
 0x342   : > { %v2856_v6 = vpop.f32.mrb[56].mxu1 }
 0x343   : > { %v6219_v54 = vadd.f32 %v8457_v44, %v2856_v6  ;;  %v4915_v14 = vpop.f32.mrb[56].mxu0  ;;  %v2858_v16 = vpop.f32.mrb[57].mxu1 }
 0x344   : > { %v4917_v25 = vpop.f32.mrb[57].mxu0  ;;  %v2859_v24 = vpop.f32.mrb[58].mxu1 }
 0x345   : > { %v6220_v29 = vadd.f32 %v6219_v54, %v4915_v14  ;;  %v6221_v55 = vadd.f32 %v8457_v44, %v2859_v24  ;;  %v4918_v56 = vpop.f32.mrb[58].mxu0  ;;  %v2861_v58 = vpop.f32.mrb[59].mxu1 }
 0x346   : > { %v4920_v59 = vpop.f32.mrb[59].mxu0 }
 0x347   : > { %4990 = vst.msk [vmem:[%s8463_s10 + $0xe0] sm:$0xff] %vm601_vm0, %v6220_v29  ;;  %v6222_v60 = vadd.f32 %v6221_v55, %v4918_v56 }
 0x349   : > { %4991 = vst.msk [vmem:[%s8463_s10 + $0xe8] sm:$0xff] %vm601_vm0, %v6222_v60 }
 0x34a   : > { %v2864_v62 = vpop.f32.mrb[60].mxu1 }
 0x34b   : > { %v6223_v63 = vadd.f32 %v8457_v44, %v2864_v62  ;;  %v4923_v48 = vpop.f32.mrb[60].mxu0  ;;  %v2866_v0 = vpop.f32.mrb[61].mxu1 }
 0x34c   : > { %v4925_v51 = vpop.f32.mrb[61].mxu0  ;;  %v2867_v3 = vpop.f32.mrb[62].mxu1 }
 0x34d   : > { %v6224_v31 = vadd.f32 %v6223_v63, %v4923_v48  ;;  %v6225_v34 = vadd.f32 %v8457_v44, %v2867_v3  ;;  %v4926_v38 = vpop.f32.mrb[62].mxu0  ;;  %v2869_v5 = vpop.f32.mrb[63].mxu1 }
 0x34e   : > { %v4928_v41 = vpop.f32.mrb[63].mxu0 }
 0x34f   : > { %4992 = vst.msk [vmem:[%s8463_s10 + $0xf0] sm:$0xff] %vm601_vm0, %v6224_v31  ;;  %v6226_v8 = vadd.f32 %v6225_v34, %v4926_v38 }
 0x351   : > { %4993 = vst.msk [vmem:[%s8463_s10 + $0xf8] sm:$0xff] %vm601_vm0, %v6226_v8 }
 0x352   : > { %7155 = shalt.err (!%p7152_p5)
}
 0x353   : > { %s7156_s29 = scalar_lea.hbm %s8566_s15, 4096  ;;  %s7160_s8 = scalar_lea.hbm %s8627_s5, 8192 }
 0x354   : > { %p7157_p6 = scmp.ne.s32.totalorder %s8566_s15, %s7156_s29  ;;  %p7161_p10 = scmp.lt.u32.totalorder %s8566_s15, %s8627_s5 }
 0x355   : > { %p7162_p11 = scmp.lt.u32.totalorder %s7160_s8, %s7156_s29  ;;  %p7164_p13 = scmp.lt.u32.totalorder %s7156_s29, %s8566_s15 }
 0x356   : > { %p7158_p7 = pnand %p7157_p6, %p7296_p4 }
 0x357   : > { %p7163_p12 = por %p7162_p11, %p7161_p10 }
 0x358   : > { %p7159_p9 = pneg %p7158_p7 }
 0x359   : > { %p7165_p0 = por %p7164_p13, %p7163_p12 }
 0x35b   : > { %p7166_p1 = pnand %p7165_p0, %p7159_p9 }
 0x35d   : > { %7169 = shalt.err (!%p7166_p1)
}
 0x35e   : > { %s7224_s11 = smov 128   ;;  %s7225_s14 = smov 8  }
 0x35f   : > { %6676 = dma.vmem_to_hbm [thread:$0]  (%p7296_p4), %s8568_s7, 4096, %s8566_s15, %s8576_s21, %s7224_s11, %s7224_s11, %s7225_s14  }
 0x360 PF: > { %p6682_p2 = scmp.ge.s32.totalorder %s7220_s23, 2  ;;  %s5026_s16 = sand.u32 1, %s7200_s18  }
 0x361   : > { %s5027_s17 = scalar_lea.sflag [#allocation3], %s5026_s16 }
 0x362   : > { %p6679_p3 = pnand %p6682_p2, %p7303_p8 }
 0x364   : > { %7195 = dma.done.wait (!%p6679_p3), %s5027_s17, 4096  }
 0x365   : > { %7197 = vsyncadd (!%p6679_p3), %s5027_s17, 4294963200  ;;  %s18_s23 = sadd.s32 1, %s7220_s23   ;;  %s8630_s18 = smov %s7204_s19 }
 0x366   : > { %p15_p5 = scmp.ge.s32.totalorder %s18_s23, 4   ;;  %s8631_s19 = smov %s7208_s20 }
 0x367   : > { %s8632_s20 = smov %s7309_s6  ;;  %s8633_s21 = smov %s7216_s22 }
 0x368   : > { %s8634_s22 = smov %s8636_s26  ;;  %17 = sbr.rel (!%p15_p5) target bundleno = 4 (0x4), region = 97 }
 0x36f   :  { %5032 = vsyncpa [#allocation3], 1 }
 0x370   :  { %5034 = vsyncpa [#allocation3 + $0x1], 1 }

</bundles_post_ra>
